<compile_context>
chip_gen: v5e
topology: v5e:2x2
jax: 0.10.0
libtpu: 0.0.40
codegen_flags: <defaults>
</compile_context>

<pallas_src>
import jax
import jax.numpy as jnp
from jax.experimental import pallas as pl
from jax.experimental.pallas import tpu as pltpu


def skconv_kernel(out1_ref, out2_ref, out3_ref, w1s_ref, bn_shift_ref,
                  w2t_ref, wlint_ref, blin_ref, o_ref):
    C = out1_ref.shape[1]
    HW = out3_ref.shape[2]
    out1 = out1_ref[...].astype(jnp.float32)                  # (tb, C)
    out2 = out2_ref[...].astype(jnp.float32)                  # (tb, C)

    # s = global_pool(map1 + map2 + map3); map1/map2 are spatially constant, so
    # only out3's spatial mean is needed (lane-axis reduce -> XLU, free here).
    s3 = jnp.sum(out3_ref[...].astype(jnp.float32), axis=-1) * (1.0 / HW)
    s = out1 + out2 + s3                                      # (tb, C)

    # fc1: 1x1 conv (C -> d) with the BN scale pre-folded into the weight,
    # then BN shift + ReLU.
    z = jnp.dot(s, w1s_ref[...], preferred_element_type=jnp.float32)
    z = jnp.maximum(z + bn_shift_ref[...], 0.0)               # (tb, d)

    # fc2: 1x1 conv (d -> M*C), softmax over the M=2 branch axis.
    ab = jnp.dot(z, w2t_ref[...], preferred_element_type=jnp.float32)
    a0 = ab[:, :C]
    a1 = ab[:, C:]
    m = jnp.maximum(a0, a1)
    e0 = jnp.exp(a0 - m)
    e1 = jnp.exp(a1 - m)
    inv = pl.reciprocal(e0 + e1, approx=True)                 # EUP slot, VPU-free

    # V = map1*w0 + map2*w1 is spatially constant (map3 intentionally excluded,
    # matching the reference zip truncation at M=2), so global_pool(V) is just:
    vp = (out1 * e0 + out2 * e1) * inv                        # (tb, C)

    # Final Linear(128, 2).  The (tb, 2) store is a masked partial store, but
    # output bytes are negligible vs. the out3 stream.
    o_ref[...] = jnp.dot(vp, wlint_ref[...],
                         preferred_element_type=jnp.float32) + blin_ref[...]


def skconv_forward(out1, out2, out3, params, *, tile_b=256):
    """out1/out2: (B, C); out3: (B, C, H, W). Returns (B, 2) float32."""
    B, C = out1.shape
    H, W = out3.shape[2], out3.shape[3]
    HW = H * W
    d = params["w1"].shape[0]

    # Free (metadata-only) reshape: no transpose, no extra HBM pass over out3.
    out3_flat = out3.reshape(B, C, HW)

    # Fold the BatchNorm scale into the fc1 weight (eval-mode running stats).
    w1s = params["w1"].T * params["bn_scale"][None, :]        # (C, d)
    bn_shift = params["bn_shift"].reshape(1, d)
    w2t = params["w2"].T                                      # (d, 2C)
    wlint = params["wlin"].T                                  # (C, 2)
    blin = params["blin"].reshape(1, 2)

    # Batch tiling.  Keep the out3 block modest (tile_b=256 -> 8 MiB block,
    # 16 MiB double-buffered) so it fits v7x's 64 MiB VMEM; on v5e/v6e
    # (128 MiB) tile_b can be raised to 512-1024.
    if B <= tile_b:
        tile_b = B                               # single block covers the batch
        Bp = B
    else:
        tile_b = max(8, (tile_b // 8) * 8)       # multi-block tiles need 8-align
        Bp = pl.cdiv(B, tile_b) * tile_b
        if Bp != B:                              # pad remainder block with zeros
            pad = Bp - B
            out1 = jnp.pad(out1, ((0, pad), (0, 0)))
            out2 = jnp.pad(out2, ((0, pad), (0, 0)))
            out3_flat = jnp.pad(out3_flat, ((0, pad), (0, 0), (0, 0)))

    grid = (Bp // tile_b,)
    bcast = lambda i: (0, 0)                     # weights: resident, not re-DMA'd

    out = pl.pallas_call(
        skconv_kernel,
        out_shape=jax.ShapeDtypeStruct((Bp, 2), jnp.float32),
        grid_spec=pltpu.PrefetchScalarGridSpec(
            num_scalar_prefetch=0,
            grid=grid,
            in_specs=[
                pl.BlockSpec((tile_b, C), lambda i: (i, 0)),          # out1
                pl.BlockSpec((tile_b, C), lambda i: (i, 0)),          # out2
                pl.BlockSpec((tile_b, C, HW), lambda i: (i, 0, 0)),   # out3 (B,C,HW)
                pl.BlockSpec((C, d), bcast),                          # fc1 W (BN-scaled)
                pl.BlockSpec((1, d), bcast),                          # BN shift
                pl.BlockSpec((d, 2 * C), bcast),                      # fc2 W
                pl.BlockSpec((C, 2), bcast),                          # linear W
                pl.BlockSpec((1, 2), bcast),                          # linear b
            ],
            out_specs=pl.BlockSpec((tile_b, 2), lambda i: (i, 0)),
        ),
        compiler_params=pltpu.CompilerParams(
            dimension_semantics=("parallel",),   # megacore-shardable on v7x
            vmem_limit_bytes=48 << 20,           # headroom for tile_b up to 512
        ),
    )(out1, out2, out3_flat, w1s, bn_shift, w2t, wlint, blin)

    return out[:B] if Bp != B else out


def skconv_reference(out1, out2, out3, params):
    """Pure-JAX mirror of the PyTorch forward (for verification)."""
    B, C = out1.shape
    H, W = out3.shape[2], out3.shape[3]
    map1 = jnp.broadcast_to(out1[:, :, None, None], (B, C, H, W))
    map2 = jnp.broadcast_to(out2[:, :, None, None], (B, C, H, W))
    map3 = out3
    U = map1 + map2 + map3
    s = jnp.mean(U, axis=(2, 3))                               # (B, C)
    z = s @ params["w1"].T
    z = z * params["bn_scale"][None, :] + params["bn_shift"][None, :]
    z = jnp.maximum(z, 0.0)
    ab = z @ params["w2"].T
    ab = ab.reshape(B, 2, C, 1)
    ab = jax.nn.softmax(ab, axis=1)
    a0 = ab[:, 0, :, 0][:, :, None, None]
    a1 = ab[:, 1, :, 0][:, :, None, None]
    V = map1 * a0 + map2 * a1
    Vp = jnp.mean(V, axis=(2, 3))
    return Vp @ params["wlin"].T + params["blin"][None, :]


def init_params(key, in_channels, out_channels, M=2, r=16, L=32):
    d = max(in_channels // r, L)
    k1, k2, k3, k4, k5, k6 = jax.random.split(key, 6)
    # BatchNorm folded with running_mean=0, running_var=1, eps=1e-5 (eval mode).
    gamma = 1.0 + 0.1 * jax.random.normal(k4, (d,), jnp.float32)
    beta = 0.1 * jax.random.normal(k5, (d,), jnp.float32)
    eps = 1e-5
    return {
        "w1": 0.1 * jax.random.normal(k1, (d, out_channels), jnp.float32),
        "w2": 0.1 * jax.random.normal(k2, (out_channels * M, d), jnp.float32),
        "wlin": 0.1 * jax.random.normal(k3, (2, 128), jnp.float32),
        "blin": 0.1 * jax.random.normal(k6, (2,), jnp.float32),
        "bn_scale": gamma / jnp.sqrt(1.0 + eps),
        "bn_shift": beta,
    }


if __name__ == "__main__":
    B = 10                   # not a multiple of tile_b -> exercises padding path
    in_channels = 128
    out_channels = 128       # must be 128 so the final Linear(128, 2) is consistent
    H = W = 8

    key = jax.random.PRNGKey(0)
    kp, kx1, kx2, kx3 = jax.random.split(key, 4)
    params = init_params(kp, in_channels, out_channels)

    out1 = jax.random.normal(kx1, (B, out_channels), jnp.float32)
    out2 = jax.random.normal(kx2, (B, out_channels), jnp.float32)
    out3 = jax.random.normal(kx3, (B, out_channels, H, W), jnp.float32)

    ref = jax.block_until_ready(skconv_reference(out1, out2, out3, params))

    # Multi-block gridded path (tile_b=8 -> 2 grid steps, remainder padded).
    result = jax.block_until_ready(
        skconv_forward(out1, out2, out3, params, tile_b=8))
    # Single-block path (default tile_b covers the whole small batch).
    result_single = jax.block_until_ready(
        skconv_forward(out1, out2, out3, params))

    assert result.shape == (B, 2)
    # Tolerance relaxed for the EUP approximate reciprocal in the softmax denom.
    assert jnp.allclose(result, ref, atol=1e-2, rtol=1e-2), (result, ref)
    assert jnp.allclose(result_single, ref, atol=1e-2, rtol=1e-2), (result_single, ref)
    print("KERNEL_OK")
</pallas_src>

<mosaic_0001>
module attributes {stable_mosaic.version = 11 : i64} {
  func.func @skconv_kernel(%arg0: i32, %arg1: memref<8x128xf32, #tpu.memory_space<vmem>>, %arg2: memref<8x128xf32, #tpu.memory_space<vmem>>, %arg3: memref<8x128x64xf32, #tpu.memory_space<vmem>>, %arg4: memref<128x32xf32, #tpu.memory_space<vmem>>, %arg5: memref<1x32xf32, #tpu.memory_space<vmem>>, %arg6: memref<32x256xf32, #tpu.memory_space<vmem>>, %arg7: memref<128x2xf32, #tpu.memory_space<vmem>>, %arg8: memref<1x2xf32, #tpu.memory_space<vmem>>, %arg9: memref<8x2xf32, #tpu.memory_space<vmem>>) attributes {dimension_semantics = [#tpu.dimension_semantics<parallel>], iteration_bounds = array<i64: 2>, scalar_prefetch = 0 : i64, scratch_operands = 0 : i64, tpu.core_type = #tpu.core_type<tc>, window_params = [{transform_indices = @transform_0, window_bounds = array<i64: 8, 128>}, {transform_indices = @transform_1, window_bounds = array<i64: 8, 128>}, {transform_indices = @transform_2, window_bounds = array<i64: 8, 128, 64>}, {pipeline_mode = #tpu.pipeline_mode<synchronous>, transform_indices = @transform_3, window_bounds = array<i64: 128, 32>}, {pipeline_mode = #tpu.pipeline_mode<synchronous>, transform_indices = @transform_4, window_bounds = array<i64: 1, 32>}, {pipeline_mode = #tpu.pipeline_mode<synchronous>, transform_indices = @transform_5, window_bounds = array<i64: 32, 256>}, {pipeline_mode = #tpu.pipeline_mode<synchronous>, transform_indices = @transform_6, window_bounds = array<i64: 128, 2>}, {pipeline_mode = #tpu.pipeline_mode<synchronous>, transform_indices = @transform_7, window_bounds = array<i64: 1, 2>}, {transform_indices = @transform_8, window_bounds = array<i64: 8, 2>}]} {
    %c0 = arith.constant 0 : index
    %c0_0 = arith.constant 0 : index
    %0 = vector.load %arg1[%c0, %c0_0] : memref<8x128xf32, #tpu.memory_space<vmem>>, vector<8x128xf32>
    %c0_1 = arith.constant 0 : index
    %c0_2 = arith.constant 0 : index
    %1 = vector.load %arg2[%c0_1, %c0_2] : memref<8x128xf32, #tpu.memory_space<vmem>>, vector<8x128xf32>
    %c0_3 = arith.constant 0 : index
    %c0_4 = arith.constant 0 : index
    %c0_5 = arith.constant 0 : index
    %2 = vector.load %arg3[%c0_3, %c0_4, %c0_5] : memref<8x128x64xf32, #tpu.memory_space<vmem>>, vector<8x128x64xf32>
    %cst = arith.constant dense<0.000000e+00> : vector<8x128xf32>
    %3 = vector.multi_reduction <add>, %2, %cst [2] : vector<8x128x64xf32> to vector<8x128xf32>
    %cst_6 = arith.constant 1.562500e-02 : f32
    %4 = vector.broadcast %cst_6 : f32 to vector<8x128xf32>
    %5 = arith.mulf %3, %4 : vector<8x128xf32>
    %6 = arith.addf %0, %1 : vector<8x128xf32>
    %7 = arith.addf %6, %5 : vector<8x128xf32>
    %c0_7 = arith.constant 0 : index
    %c0_8 = arith.constant 0 : index
    %8 = vector.load %arg4[%c0_7, %c0_8] : memref<128x32xf32, #tpu.memory_space<vmem>>, vector<128x32xf32>
    %cst_9 = arith.constant dense<0.000000e+00> : vector<8x32xf32>
    %9 = tpu.matmul %7, %8, %cst_9 {dimension_numbers = #tpu.dot_dimension_numbers<[1], [0], [0], [1], [0, 0, 1, 1], [], []>} : vector<8x128xf32>, vector<128x32xf32>, vector<8x32xf32> -> vector<8x32xf32>
    %c0_10 = arith.constant 0 : index
    %c0_11 = arith.constant 0 : index
    %10 = vector.load %arg5[%c0_10, %c0_11] : memref<1x32xf32, #tpu.memory_space<vmem>>, vector<1x32xf32>
    %11 = vector.broadcast %10 : vector<1x32xf32> to vector<8x32xf32>
    %12 = arith.addf %9, %11 : vector<8x32xf32>
    %cst_12 = arith.constant 0.000000e+00 : f32
    %13 = vector.broadcast %cst_12 : f32 to vector<8x32xf32>
    %14 = arith.maximumf %12, %13 : vector<8x32xf32>
    %c0_13 = arith.constant 0 : index
    %c0_14 = arith.constant 0 : index
    %15 = vector.load %arg6[%c0_13, %c0_14] : memref<32x256xf32, #tpu.memory_space<vmem>>, vector<32x256xf32>
    %cst_15 = arith.constant dense<0.000000e+00> : vector<8x256xf32>
    %16 = tpu.matmul %14, %15, %cst_15 {dimension_numbers = #tpu.dot_dimension_numbers<[1], [0], [0], [1], [0, 0, 1, 1], [], []>} : vector<8x32xf32>, vector<32x256xf32>, vector<8x256xf32> -> vector<8x256xf32>
    %17 = vector.extract_strided_slice %16 {offsets = [0, 0], sizes = [8, 128], strides = [1, 1]} : vector<8x256xf32> to vector<8x128xf32>
    %18 = vector.extract_strided_slice %16 {offsets = [0, 128], sizes = [8, 128], strides = [1, 1]} : vector<8x256xf32> to vector<8x128xf32>
    %19 = arith.maximumf %17, %18 : vector<8x128xf32>
    %20 = arith.subf %17, %19 : vector<8x128xf32>
    %21 = math.exp %20 : vector<8x128xf32>
    %22 = arith.subf %18, %19 : vector<8x128xf32>
    %23 = math.exp %22 : vector<8x128xf32>
    %24 = arith.addf %21, %23 : vector<8x128xf32>
    %25 = tpu.reciprocal %24 {approx = true} : vector<8x128xf32> -> vector<8x128xf32>
    %26 = arith.mulf %0, %21 : vector<8x128xf32>
    %27 = arith.mulf %1, %23 : vector<8x128xf32>
    %28 = arith.addf %26, %27 : vector<8x128xf32>
    %29 = arith.mulf %28, %25 : vector<8x128xf32>
    %c0_16 = arith.constant 0 : index
    %c0_17 = arith.constant 0 : index
    %30 = vector.load %arg7[%c0_16, %c0_17] : memref<128x2xf32, #tpu.memory_space<vmem>>, vector<128x2xf32>
    %cst_18 = arith.constant dense<0.000000e+00> : vector<8x2xf32>
    %31 = tpu.matmul %29, %30, %cst_18 {dimension_numbers = #tpu.dot_dimension_numbers<[1], [0], [0], [1], [0, 0, 1, 1], [], []>} : vector<8x128xf32>, vector<128x2xf32>, vector<8x2xf32> -> vector<8x2xf32>
    %c0_19 = arith.constant 0 : index
    %c0_20 = arith.constant 0 : index
    %32 = vector.load %arg8[%c0_19, %c0_20] : memref<1x2xf32, #tpu.memory_space<vmem>>, vector<1x2xf32>
    %33 = vector.broadcast %32 : vector<1x2xf32> to vector<8x2xf32>
    %34 = arith.addf %31, %33 : vector<8x2xf32>
    %c0_21 = arith.constant 0 : index
    %c0_22 = arith.constant 0 : index
    %35 = vector.load %arg9[%c0_21, %c0_22] : memref<8x2xf32, #tpu.memory_space<vmem>>, vector<8x2xf32>
    tpu.vector_store %arg9[%c0_21, %c0_22], %34 {strides = array<i32>} : memref<8x2xf32, #tpu.memory_space<vmem>>, vector<8x2xf32>,
    return
  }
  func.func @transform_0(%arg0: i32) -> (i32, i32) {
    %c0_i32 = arith.constant 0 : i32
    %c0_i32_0 = arith.constant 0 : i32
    return %arg0, %c0_i32 : i32, i32
  }
  func.func @transform_1(%arg0: i32) -> (i32, i32) {
    %c0_i32 = arith.constant 0 : i32
    %c0_i32_0 = arith.constant 0 : i32
    return %arg0, %c0_i32 : i32, i32
  }
  func.func @transform_2(%arg0: i32) -> (i32, i32, i32) {
    %c0_i32 = arith.constant 0 : i32
    %c0_i32_0 = arith.constant 0 : i32
    %c0_i32_1 = arith.constant 0 : i32
    return %arg0, %c0_i32, %c0_i32_0 : i32, i32, i32
  }
  func.func @transform_3(%arg0: i32) -> (i32, i32) {
    %c0_i32 = arith.constant 0 : i32
    %c0_i32_0 = arith.constant 0 : i32
    %c0_i32_1 = arith.constant 0 : i32
    return %c0_i32, %c0_i32_0 : i32, i32
  }
  func.func @transform_4(%arg0: i32) -> (i32, i32) {
    %c0_i32 = arith.constant 0 : i32
    %c0_i32_0 = arith.constant 0 : i32
    %c0_i32_1 = arith.constant 0 : i32
    return %c0_i32, %c0_i32_0 : i32, i32
  }
  func.func @transform_5(%arg0: i32) -> (i32, i32) {
    %c0_i32 = arith.constant 0 : i32
    %c0_i32_0 = arith.constant 0 : i32
    %c0_i32_1 = arith.constant 0 : i32
    return %c0_i32, %c0_i32_0 : i32, i32
  }
  func.func @transform_6(%arg0: i32) -> (i32, i32) {
    %c0_i32 = arith.constant 0 : i32
    %c0_i32_0 = arith.constant 0 : i32
    %c0_i32_1 = arith.constant 0 : i32
    return %c0_i32, %c0_i32_0 : i32, i32
  }
  func.func @transform_7(%arg0: i32) -> (i32, i32) {
    %c0_i32 = arith.constant 0 : i32
    %c0_i32_0 = arith.constant 0 : i32
    %c0_i32_1 = arith.constant 0 : i32
    return %c0_i32, %c0_i32_0 : i32, i32
  }
  func.func @transform_8(%arg0: i32) -> (i32, i32) {
    %c0_i32 = arith.constant 0 : i32
    %c0_i32_0 = arith.constant 0 : i32
    return %arg0, %c0_i32 : i32, i32
  }
}

</mosaic_0001>

<bundles_post_ra>
// kernel: tpu_custom_call.1
= control target key start
LH: loop header
LB: loop body
LE: loop exit
PB: predicated region body
PF: predicated region fallthrough
CT: control target
= control target key end

     0   :  { %s1721_s27 = smov 0   ;;  %s2576_s0 = inlined_call_operand.vmem [shape: f32[16,128], index: 0, kind: input, shape index: {}]   ;;  %s2577_s1 = inlined_call_operand.vmem [shape: f32[16,128], index: 1, kind: input, shape index: {}]   ;;  %s2578_s2 = inlined_call_operand.vmem [shape: f32[16,128,64], index: 2, kind: input, shape index: {}]   ;;  %s2579_s3 = inlined_call_operand.vmem [shape: f32[128,32], index: 3, kind: input, shape index: {}]   ;;  %s2580_s4 = inlined_call_operand.vmem [shape: f32[1,32], index: 4, kind: input, shape index: {}]   ;;  %s2581_s5 = inlined_call_operand.vmem [shape: f32[32,256], index: 5, kind: input, shape index: {}]   ;;  %s2582_s6 = inlined_call_operand.vmem [shape: f32[128,2], index: 6, kind: input, shape index: {}]   ;;  %s2583_s7 = inlined_call_operand.vmem [shape: f32[1,2], index: 7, kind: input, shape index: {}]   ;;  %s2584_s8 = inlined_call_operand.vmem [shape: f32[16,2], index: 8, kind: output, shape index: {}]  }
   0x1 LB: > { %s1727_s28 = sadd.s32 4294967295, %s1674_s27   ;;  %p1640_p0 = scmp.ge.s32.totalorder %s1674_s27, 1  ;;  %s1674_s27 = sphi %s1721_s27, %s18_s27  }
   0x2   : > { %p282_p1 = scmp.lt.s32.totalorder %s1674_s27, 3 }
   0x4   : > { %p283_p2 = pnand %p1640_p0, %p282_p1 }
   0x5   : > { %s1643_s29 = sshll.u32 (!%p283_p2), %s1727_s28, 3  ;;  %p324_p4 = scmp.lt.s32.totalorder (!%p283_p2), %s1727_s28, 1 }
   0x6   : > { %286 = sbr.rel (%p283_p2) target bundleno = 900 (0x384), region = 52  ;;  %p333_p3 = scmp.lt.s32.totalorder (!%p283_p2), %s1643_s29, 15 }
   0xb   : > { %s2586_s29 = smov (!%p333_p3, %s1643_s29), 15  ;;  %vm473_vm0 = vcmask 523264   ;;  %vm1120_vm1 = vcmask 130112   ;;  %vm1124_vm2 = vcmask 195712   ;;  %vm1128_vm3 = vcmask 261312   ;;  %s2588_s28 = smov (!%p324_p4, %s1727_s28), 1 }
   0xc   : > { %s1651_s30 = sshll.u32 %s2586_s29, 7  ;;  %vm1132_vm4 = vcmask 326912   ;;  %vm1136_vm5 = vcmask 392512   ;;  %vm1140_vm6 = vcmask 458112   ;;  %vm1144_vm7 = vcmask 523712  }
   0xd   : > { %s1735_s11 = scalar_lea.vmem %s2578_s2, %s1651_s30  ;;  %vm1148_vm8 = vcmask 589312   ;;  %vm1152_vm9 = vcmask 654912   ;;  %vm1156_vm10 = vcmask 720512   ;;  %vm1160_vm11 = vcmask 786112   ;;  %s2461_s30 = sshll.u32 %s2588_s28, 3 }
   0xe   : > { %v361_v0 = vld [vmem:[%s1735_s11 + $0x80] sm:$0xff]  ;;  %v347_v1 = vld [vmem:[%s1735_s11 + $0x10] sm:$0xff]  ;;  %v362_v6 = vld [vmem:[%s1735_s11 + $0x88] sm:$0xff]  ;;  %vm1164_vm12 = vcmask 851712   ;;  %vm1168_vm13 = vcmask 917312   ;;  %vm1172_vm14 = vcmask 982912   ;;  %s327_s28 = scalar_lea.vmem %s2576_s0, %s2461_s30  ;;  %s331_s13 = scalar_lea.vmem %s2577_s1, %s2461_s30 }
   0xf   : > { %v345_v2 = vld [vmem:[%s1735_s11] sm:$0xff]  ;;  %v522_v3 = vsel %vm473_vm0, %v361_v0, 0.0  ;;  %v480_v4 = vsel %vm473_vm0, %v347_v1, 0.0  ;;  %v363_v7 = vld [vmem:[%s1735_s11 + $0x90] sm:$0xff]  ;;  %v346_v8 = vld [vmem:[%s1735_s11 + $0x8] sm:$0xff]  ;;  %v525_v9 = vsel %vm473_vm0, %v362_v6, 0.0  ;;  %s342_s24 = scalar_lea.vmem %s2584_s8, %s2461_s30 }
  0x10   : > { %v474_v5 = vsel %vm473_vm0, %v345_v2, 0.0  ;;  %523 = vadd.xlane.f32.xlu1 %v522_v3  ;;  %481 = vadd.xlane.f32.xlu2 %v480_v4  ;;  %v528_v10 = vsel %vm473_vm0, %v363_v7, 0.0  ;;  %v477_v11 = vsel %vm473_vm0, %v346_v8, 0.0  ;;  %v378_v12 = vld [vmem:[%s1735_s11 + $0x108] sm:$0xff]  ;;  %v348_v13 = vld [vmem:[%s1735_s11 + $0x18] sm:$0xff]  ;;  %v377_v14 = vld [vmem:[%s1735_s11 + $0x100] sm:$0xff] }
  0x11   : > { %475 = vadd.xlane.f32.xlu0 %v474_v5  ;;  %v573_v15 = vsel %vm473_vm0, %v378_v12, 0.0  ;;  %v483_v16 = vsel %vm473_vm0, %v348_v13, 0.0  ;;  %v570_v17 = vsel %vm473_vm0, %v377_v14, 0.0  ;;  %v379_v18 = vld [vmem:[%s1735_s11 + $0x110] sm:$0xff]  ;;  %v393_v19 = vld [vmem:[%s1735_s11 + $0x180] sm:$0xff]  ;;  %v364_v20 = vld [vmem:[%s1735_s11 + $0x98] sm:$0xff] }
  0x12   : > { %v576_v21 = vsel %vm473_vm0, %v379_v18, 0.0  ;;  %v618_v22 = vsel %vm473_vm0, %v393_v19, 0.0  ;;  %v531_v23 = vsel %vm473_vm0, %v364_v20, 0.0  ;;  %v349_v24 = vld [vmem:[%s1735_s11 + $0x20] sm:$0xff]  ;;  %v394_v26 = vld [vmem:[%s1735_s11 + $0x188] sm:$0xff]  ;;  %v395_v30 = vld [vmem:[%s1735_s11 + $0x190] sm:$0xff] }
  0x13   : > { %v365_v25 = vld [vmem:[%s1735_s11 + $0xa0] sm:$0xff]  ;;  %v486_v27 = vsel %vm473_vm0, %v349_v24, 0.0  ;;  %v621_v29 = vsel %vm473_vm0, %v394_v26, 0.0  ;;  %v380_v32 = vld [vmem:[%s1735_s11 + $0x118] sm:$0xff]  ;;  %v624_v33 = vsel %vm473_vm0, %v395_v30, 0.0  ;;  %v350_v36 = vld [vmem:[%s1735_s11 + $0x28] sm:$0xff] }
  0x14   : > { %v534_v28 = vsel %vm473_vm0, %v365_v25, 0.0  ;;  %v409_v31 = vld [vmem:[%s1735_s11 + $0x200] sm:$0xff]  ;;  %v579_v35 = vsel %vm473_vm0, %v380_v32, 0.0  ;;  %v366_v37 = vld [vmem:[%s1735_s11 + $0xa8] sm:$0xff]  ;;  %v489_v39 = vsel %vm473_vm0, %v350_v36, 0.0  ;;  %v396_v42 = vld [vmem:[%s1735_s11 + $0x198] sm:$0xff] }
  0x15   : > { %v666_v34 = vsel %vm473_vm0, %v409_v31, 0.0  ;;  %v410_v38 = vld [vmem:[%s1735_s11 + $0x208] sm:$0xff]  ;;  %v537_v40 = vsel %vm473_vm0, %v366_v37, 0.0  ;;  %v411_v43 = vld [vmem:[%s1735_s11 + $0x210] sm:$0xff]  ;;  %v381_v44 = vld [vmem:[%s1735_s11 + $0x120] sm:$0xff]  ;;  %v627_v45 = vsel %vm473_vm0, %v396_v42, 0.0 }
  0x16   : > { %v669_v41 = vsel %vm473_vm0, %v410_v38, 0.0  ;;  %v672_v46 = vsel %vm473_vm0, %v411_v43, 0.0  ;;  %v582_v47 = vsel %vm473_vm0, %v381_v44, 0.0  ;;  %v426_v48 = vld [vmem:[%s1735_s11 + $0x288] sm:$0xff]  ;;  %v351_v49 = vld [vmem:[%s1735_s11 + $0x30] sm:$0xff]  ;;  %v425_v50 = vld [vmem:[%s1735_s11 + $0x280] sm:$0xff] }
  0x17   : > { %v717_v51 = vsel %vm473_vm0, %v426_v48, 0.0  ;;  %v492_v52 = vsel %vm473_vm0, %v351_v49, 0.0  ;;  %v714_v53 = vsel %vm473_vm0, %v425_v50, 0.0  ;;  %v382_v54 = vld [vmem:[%s1735_s11 + $0x128] sm:$0xff]  ;;  %v397_v55 = vld [vmem:[%s1735_s11 + $0x1a0] sm:$0xff]  ;;  %v367_v56 = vld [vmem:[%s1735_s11 + $0xb0] sm:$0xff] }
  0x18   : > { %526 = vadd.xlane.f32.xlu1 %v525_v9  ;;  %529 = vadd.xlane.f32.xlu2 %v528_v10  ;;  %v585_v57 = vsel %vm473_vm0, %v382_v54, 0.0  ;;  %v630_v58 = vsel %vm473_vm0, %v397_v55, 0.0  ;;  %v540_v59 = vsel %vm473_vm0, %v367_v56, 0.0  ;;  %v427_v60 = vld [vmem:[%s1735_s11 + $0x290] sm:$0xff]  ;;  %v441_v61 = vld [vmem:[%s1735_s11 + $0x300] sm:$0xff]  ;;  %v412_v62 = vld [vmem:[%s1735_s11 + $0x218] sm:$0xff] }
  0x19   : > { %478 = vadd.xlane.f32.xlu0 %v477_v11  ;;  %v720_v63 = vsel %vm473_vm0, %v427_v60, 0.0  ;;  %v762_v0 = vsel %vm473_vm0, %v441_v61, 0.0  ;;  %v675_v1 = vsel %vm473_vm0, %v412_v62, 0.0  ;;  %v352_v2 = vld [vmem:[%s1735_s11 + $0x38] sm:$0xff]  ;;  %v442_v4 = vld [vmem:[%s1735_s11 + $0x308] sm:$0xff]  ;;  %v413_v9 = vld [vmem:[%s1735_s11 + $0x220] sm:$0xff] }
  0x1a   : > { %v368_v3 = vld [vmem:[%s1735_s11 + $0xb8] sm:$0xff]  ;;  %v495_v5 = vsel %vm473_vm0, %v352_v2, 0.0  ;;  %v765_v7 = vsel %vm473_vm0, %v442_v4, 0.0  ;;  %v398_v8 = vld [vmem:[%s1735_s11 + $0x1a8] sm:$0xff]  ;;  %v383_v10 = vld [vmem:[%s1735_s11 + $0x130] sm:$0xff]  ;;  %v678_v12 = vsel %vm473_vm0, %v413_v9, 0.0 }
  0x1b   : > { %v543_v6 = vsel %vm473_vm0, %v368_v3, 0.0  ;;  %v633_v11 = vsel %vm473_vm0, %v398_v8, 0.0  ;;  %v588_v13 = vsel %vm473_vm0, %v383_v10, 0.0  ;;  %v443_v14 = vld [vmem:[%s1735_s11 + $0x310] sm:$0xff]  ;;  %v353_v20 = vld [vmem:[%s1735_s11 + $0x40] sm:$0xff]  ;;  %v384_v31 = vld [vmem:[%s1735_s11 + $0x138] sm:$0xff] }
  0x1c   : > { %v399_v26 = vld [vmem:[%s1735_s11 + $0x1b0] sm:$0xff]  ;;  %v429_v43 = vld [vmem:[%s1735_s11 + $0x2a0] sm:$0xff]  ;;  %vm1176_vm15 = vcmask 1048512  }
  0x1d   : > { %v459_v42 = vld [vmem:[%s1735_s11 + $0x390] sm:$0xff]  ;;  %v385_v2 = vld [vmem:[%s1735_s11 + $0x140] sm:$0xff] }
  0x20   : > { %574 = vadd.xlane.f32.xlu1 %v573_v15  ;;  %484 = vadd.xlane.f32.xlu2 %v483_v16  ;;  %v457_v15 = vld [vmem:[%s1735_s11 + $0x380] sm:$0xff]  ;;  %v428_v16 = vld [vmem:[%s1735_s11 + $0x298] sm:$0xff] }
  0x21   : > { %571 = vadd.xlane.f32.xlu0 %v570_v17  ;;  %v768_v17 = vsel %vm473_vm0, %v443_v14, 0.0  ;;  %v810_v18 = vsel %vm473_vm0, %v457_v15, 0.0  ;;  %v723_v19 = vsel %vm473_vm0, %v428_v16, 0.0 }
  0x28   : > { %577 = vadd.xlane.f32.xlu1 %v576_v21  ;;  %619 = vadd.xlane.f32.xlu2 %v618_v22  ;;  %v369_v21 = vld [vmem:[%s1735_s11 + $0xc0] sm:$0xff]  ;;  %v458_v22 = vld [vmem:[%s1735_s11 + $0x388] sm:$0xff] }
  0x29   : > { %532 = vadd.xlane.f32.xlu0 %v531_v23  ;;  %v498_v23 = vsel %vm473_vm0, %v353_v20, 0.0  ;;  %v546_v24 = vsel %vm473_vm0, %v369_v21, 0.0  ;;  %v813_v25 = vsel %vm473_vm0, %v458_v22, 0.0  ;;  %v400_v22 = vld [vmem:[%s1735_s11 + $0x1b8] sm:$0xff] }
  0x30   : > { %487 = vadd.xlane.f32.xlu1 %v486_v27  ;;  %535 = vadd.xlane.f32.xlu2 %v534_v28  ;;  %v414_v27 = vld [vmem:[%s1735_s11 + $0x228] sm:$0xff]  ;;  %v1115_v28 = vlaneseq }
  0x31   : > { %622 = vadd.xlane.f32.xlu0 %v621_v29 }
  0x32   : > { %v1833_v36 = vand.u32 127, %v1115_v28 }
  0x34   : > { %v1836_v37 = vadd.s32 4294967280, %v1833_v36 }
  0x38   : > { %625 = vadd.xlane.f32.xlu1 %v624_v33  ;;  %667 = vadd.xlane.f32.xlu2 %v666_v34  ;;  %v636_v33 = vsel %vm473_vm0, %v399_v26, 0.0  ;;  %v681_v34 = vsel %vm473_vm0, %v414_v27, 0.0 }
  0x39   : > { %580 = vadd.xlane.f32.xlu0 %v579_v35  ;;  %v591_v35 = vsel %vm473_vm0, %v384_v31, 0.0 }
  0x40   : > { %490 = vadd.xlane.f32.xlu1 %v489_v39  ;;  %538 = vadd.xlane.f32.xlu2 %v537_v40  ;;  %v1839_v40 = vadd.s32 4294967288, %v1833_v36 }
  0x41   : > { %670 = vadd.xlane.f32.xlu0 %v669_v41  ;;  %v444_v41 = vld [vmem:[%s1735_s11 + $0x318] sm:$0xff] }
  0x48   : > { %628 = vadd.xlane.f32.xlu1 %v627_v45  ;;  %673 = vadd.xlane.f32.xlu2 %v672_v46 }
  0x49   : > { %583 = vadd.xlane.f32.xlu0 %v582_v47 }
  0x50   : > { %718 = vadd.xlane.f32.xlu1 %v717_v51  ;;  %493 = vadd.xlane.f32.xlu2 %v492_v52  ;;  %v771_v51 = vsel %vm473_vm0, %v444_v41, 0.0  ;;  %v816_v52 = vsel %vm473_vm0, %v459_v42, 0.0  ;;  %v445_v42 = vld [vmem:[%s1735_s11 + $0x320] sm:$0xff] }
  0x51   : > { %715 = vadd.xlane.f32.xlu0 %v714_v53  ;;  %v726_v53 = vsel %vm473_vm0, %v429_v43, 0.0 }
  0x58   : > { %586 = vadd.xlane.f32.xlu1 %v585_v57  ;;  %631 = vadd.xlane.f32.xlu2 %v630_v58 }
  0x59   : > { %541 = vadd.xlane.f32.xlu0 %v540_v59 }
  0x60   : > { %721 = vadd.xlane.f32.xlu1 %v720_v63  ;;  %763 = vadd.xlane.f32.xlu2 %v762_v0  ;;  %v1857_v63 = vadd.s32 4294967272, %v1833_v36 }
  0x61   : > { %676 = vadd.xlane.f32.xlu0 %v675_v1  ;;  %v370_v1 = vld [vmem:[%s1735_s11 + $0xc8] sm:$0xff] }
  0x62   : > { %v549_v10 = vsel %vm473_vm0, %v370_v1, 0.0 }
  0x68   : > { %496 = vadd.xlane.f32.xlu1 %v495_v5  ;;  %544 = vadd.xlane.f32.xlu2 %v543_v6  ;;  %v354_v5 = vld [vmem:[%s1735_s11 + $0x48] sm:$0xff] }
  0x69   : > { %766 = vadd.xlane.f32.xlu0 %v765_v7  ;;  %v501_v14 = vsel %vm473_vm0, %v354_v5, 0.0 }
  0x70   : > { %634 = vadd.xlane.f32.xlu1 %v633_v11  ;;  %679 = vadd.xlane.f32.xlu2 %v678_v12  ;;  %v594_v11 = vsel %vm473_vm0, %v385_v2, 0.0 }
  0x71   : > { %589 = vadd.xlane.f32.xlu0 %v588_v13 }
  0x78   : > { %769 = vadd.xlane.f32.xlu1 %v768_v17  ;;  %811 = vadd.xlane.f32.xlu2 %v810_v18  ;;  %v415_v18 = vld [vmem:[%s1735_s11 + $0x230] sm:$0xff] }
  0x79   : > { %724 = vadd.xlane.f32.xlu0 %v723_v19  ;;  %v430_v19 = vld [vmem:[%s1735_s11 + $0x2a8] sm:$0xff]  ;;  %v684_v26 = vsel %vm473_vm0, %v415_v18, 0.0 }
  0x7a   : > { %v729_v27 = vsel %vm473_vm0, %v430_v19, 0.0 }
  0x80   : > { %499 = vadd.xlane.f32.xlu1 %v498_v23  ;;  %547 = vadd.xlane.f32.xlu2 %v546_v24 }
  0x81   : > { %814 = vadd.xlane.f32.xlu0 %v813_v25 }
  0x83   : > { %v524_v29 = vpop.xlane.xlu1 %523  ;;  %v482_v30 = vpop.xlane.xlu2 %481 }
  0x84   : > { %v476_v32 = vpop.xlane.xlu0 %475  ;;  %v874_v38 = vmul.f32 0.015625, %v524_v29  ;;  %v860_v39 = vmul.f32 0.015625, %v482_v30  ;;  %v639_v29 = vsel %vm473_vm0, %v400_v22, 0.0 }
  0x85   : > { %v858_v44 = vmul.f32 0.015625, %v476_v32 }
  0x86   : > { %v1178_v54 = vperm.slane %v874_v38, %v1833_v36  ;;  %v1123_v55 = vperm.slane %v860_v39, %v1836_v37  ;;  %v355_v38 = vld [vmem:[%s1735_s11 + $0x50] sm:$0xff] }
  0x87   : > { %v1117_v58 = vperm.slane %v858_v44, %v1833_v36 }
  0x88   : > { %637 = vadd.xlane.f32.xlu1 %v636_v33  ;;  %682 = vadd.xlane.f32.xlu2 %v681_v34  ;;  %v1882_v34 = vadd.s32 4294967264, %v1833_v36 }
  0x89   : > { %592 = vadd.xlane.f32.xlu0 %v591_v35  ;;  %v460_v35 = vld [vmem:[%s1735_s11 + $0x398] sm:$0xff] }
  0x8b   : > { %v527_v45 = vpop.xlane.xlu1 %526  ;;  %v530_v46 = vpop.xlane.xlu2 %529 }
  0x8c   : > { %v875_v47 = vmul.f32 0.015625, %v527_v45  ;;  %v876_v48 = vmul.f32 0.015625, %v530_v46  ;;  %v479_v49 = vpop.xlane.xlu0 %478 }
  0x8d   : > { %v859_v50 = vmul.f32 0.015625, %v479_v49  ;;  %v504_v49 = vsel %vm473_vm0, %v355_v38, 0.0 }
  0x8e   : > { %v1179_v56 = vperm.slane %v875_v47, %v1839_v40  ;;  %v1181_v57 = vperm.slane %v876_v48, %v1836_v37  ;;  %v819_v48 = vsel %vm473_vm0, %v460_v35, 0.0  ;;  %v461_v35 = vld [vmem:[%s1735_s11 + $0x3a0] sm:$0xff] }
  0x8f   : > { %v1119_v59 = vperm.slane %v859_v50, %v1839_v40 }
  0x90   : > { %v1180_v60 = vsel %vm1120_vm1, %v1179_v56, %v1178_v54  ;;  %772 = vadd.xlane.f32.xlu1 %v771_v51  ;;  %817 = vadd.xlane.f32.xlu2 %v816_v52  ;;  %v774_v52 = vsel %vm473_vm0, %v445_v42, 0.0 }
  0x91   : > { %v1182_v61 = vsel %vm1124_vm2, %v1181_v57, %v1180_v60  ;;  %v1121_v62 = vsel %vm1120_vm1, %v1119_v59, %v1117_v58  ;;  %727 = vadd.xlane.f32.xlu0 %v726_v53  ;;  %v386_v57 = vld [vmem:[%s1735_s11 + $0x148] sm:$0xff]  ;;  %v401_v58 = vld [vmem:[%s1735_s11 + $0x1c0] sm:$0xff] }
  0x92   : > { %v1125_v0 = vsel %vm1124_vm2, %v1123_v55, %v1121_v62  ;;  %v597_v2 = vsel %vm473_vm0, %v386_v57, 0.0  ;;  %v387_v57 = vld [vmem:[%s1735_s11 + $0x150] sm:$0xff] }
  0x93   : > { %v575_v3 = vpop.xlane.xlu1 %574  ;;  %v485_v4 = vpop.xlane.xlu2 %484 }
  0x94   : > { %v891_v6 = vmul.f32 0.015625, %v575_v3  ;;  %v861_v7 = vmul.f32 0.015625, %v485_v4  ;;  %v572_v8 = vpop.xlane.xlu0 %571  ;;  %v642_v3 = vsel %vm473_vm0, %v401_v58, 0.0 }
  0x95   : > { %v890_v9 = vmul.f32 0.015625, %v572_v8 }
  0x96   : > { %v1210_v12 = vperm.slane %v891_v6, %v1839_v40  ;;  %v1127_v13 = vperm.slane %v861_v7, %v1857_v63 }
  0x97   : > { %v1209_v15 = vperm.slane %v890_v9, %v1833_v36 }
  0x98   : > { %v1129_v16 = vsel %vm1128_vm3, %v1127_v13, %v1125_v0  ;;  %550 = vadd.xlane.f32.xlu1 %v549_v10  ;;  %595 = vadd.xlane.f32.xlu2 %v594_v11  ;;  %v1908_v10 = vadd.s32 4294967256, %v1833_v36  ;;  %v431_v11 = vld [vmem:[%s1735_s11 + $0x2b0] sm:$0xff] }
  0x99   : > { %v1211_v17 = vsel %vm1120_vm1, %v1210_v12, %v1209_v15  ;;  %502 = vadd.xlane.f32.xlu0 %v501_v14  ;;  %v446_v12 = vld [vmem:[%s1735_s11 + $0x328] sm:$0xff]  ;;  %v416_v15 = vld [vmem:[%s1735_s11 + $0x238] sm:$0xff] }
  0x9a   : > { %v777_v22 = vsel %vm473_vm0, %v446_v12, 0.0  ;;  %v432_v12 = vld [vmem:[%s1735_s11 + $0x2b8] sm:$0xff] }
  0x9b   : > { %v578_v20 = vpop.xlane.xlu1 %577  ;;  %v620_v21 = vpop.xlane.xlu2 %619 }
  0x9c   : > { %v892_v23 = vmul.f32 0.015625, %v578_v20  ;;  %v533_v24 = vpop.xlane.xlu0 %532  ;;  %v906_v32 = vmul.f32 0.015625, %v620_v21  ;;  %v732_v21 = vsel %vm473_vm0, %v431_v11, 0.0 }
  0x9d   : > { %v877_v25 = vmul.f32 0.015625, %v533_v24 }
  0x9e   : > { %v1212_v28 = vperm.slane %v892_v23, %v1836_v37  ;;  %v1240_v46 = vperm.slane %v906_v32, %v1833_v36 }
  0x9f   : > { %v1183_v30 = vperm.slane %v877_v25, %v1857_v63  ;;  %v687_v25 = vsel %vm473_vm0, %v416_v15, 0.0 }
  0xa0   : > { %v1213_v31 = vsel %vm1124_vm2, %v1212_v28, %v1211_v17  ;;  %685 = vadd.xlane.f32.xlu1 %v684_v26  ;;  %730 = vadd.xlane.f32.xlu2 %v729_v27 }
  0xa1   : > { %v1184_v33 = vsel %vm1128_vm3, %v1183_v30, %v1182_v61  ;;  %640 = vadd.xlane.f32.xlu0 %v639_v29  ;;  %v371_v61 = vld [vmem:[%s1735_s11 + $0xd0] sm:$0xff]  ;;  %v356_v30 = vld [vmem:[%s1735_s11 + $0x58] sm:$0xff] }
  0xa2   : > { %v552_v5 = vsel %vm473_vm0, %v371_v61, 0.0 }
  0xa3   : > { %v488_v39 = vpop.xlane.xlu1 %487  ;;  %v536_v41 = vpop.xlane.xlu2 %535 }
  0xa4   : > { %v862_v43 = vmul.f32 0.015625, %v488_v39  ;;  %v878_v44 = vmul.f32 0.015625, %v536_v41  ;;  %v623_v45 = vpop.xlane.xlu0 %622 }
  0xa5   : > { %v907_v47 = vmul.f32 0.015625, %v623_v45 }
  0xa6   : > { %v1131_v50 = vperm.slane %v862_v43, %v1882_v34  ;;  %v1185_v51 = vperm.slane %v878_v44, %v1882_v34  ;;  %v507_v43 = vsel %vm473_vm0, %v356_v30, 0.0 }
  0xa7   : > { %v1241_v53 = vperm.slane %v907_v47, %v1839_v40  ;;  %v822_v47 = vsel %vm473_vm0, %v461_v35, 0.0 }
  0xa8   : > { %v1133_v54 = vsel %vm1132_vm4, %v1131_v50, %v1129_v16  ;;  %v1186_v55 = vsel %vm1132_vm4, %v1185_v51, %v1184_v33  ;;  %820 = vadd.xlane.f32.xlu1 %v819_v48  ;;  %505 = vadd.xlane.f32.xlu2 %v504_v49 }
  0xa9   : > { %v1242_v56 = vsel %vm1120_vm1, %v1241_v53, %v1240_v46  ;;  %775 = vadd.xlane.f32.xlu0 %v774_v52  ;;  %v1940_v52 = vadd.s32 4294967248, %v1833_v36  ;;  %v402_v53 = vld [vmem:[%s1735_s11 + $0x1c8] sm:$0xff] }
  0xab   : > { %v626_v59 = vpop.xlane.xlu1 %625  ;;  %v668_v60 = vpop.xlane.xlu2 %667 }
  0xac   : > { %v908_v62 = vmul.f32 0.015625, %v626_v59  ;;  %v581_v0 = vpop.xlane.xlu0 %580  ;;  %v922_v8 = vmul.f32 0.015625, %v668_v60 }
  0xad   : > { %v893_v1 = vmul.f32 0.015625, %v581_v0 }
  0xae   : > { %v1243_v4 = vperm.slane %v908_v62, %v1836_v37  ;;  %v1271_v19 = vperm.slane %v922_v8, %v1833_v36  ;;  %v645_v62 = vsel %vm473_vm0, %v402_v53, 0.0  ;;  %v462_v8 = vld [vmem:[%s1735_s11 + $0x3a8] sm:$0xff]  ;;  %v403_v53 = vld [vmem:[%s1735_s11 + $0x1d0] sm:$0xff] }
  0xaf   : > { %v1214_v6 = vperm.slane %v893_v1, %v1857_v63 }
  0xb0   : > { %v1244_v7 = vsel %vm1124_vm2, %v1243_v4, %v1242_v56  ;;  %598 = vadd.xlane.f32.xlu1 %v597_v2  ;;  %643 = vadd.xlane.f32.xlu2 %v642_v3  ;;  %v600_v3 = vsel %vm473_vm0, %v387_v57, 0.0 }
  0xb1   : > { %v1215_v9 = vsel %vm1128_vm3, %v1214_v6, %v1213_v31  ;;  %553 = vadd.xlane.f32.xlu0 %v552_v5  ;;  %v372_v31 = vld [vmem:[%s1735_s11 + $0xd8] sm:$0xff] }
  0xb2   : > { %v555_v44 = vsel %vm473_vm0, %v372_v31, 0.0  ;;  %v357_v31 = vld [vmem:[%s1735_s11 + $0x60] sm:$0xff] }
  0xb3   : > { %v491_v13 = vpop.xlane.xlu1 %490  ;;  %v539_v14 = vpop.xlane.xlu2 %538 }
  0xb4   : > { %v863_v16 = vmul.f32 0.015625, %v491_v13  ;;  %v879_v17 = vmul.f32 0.015625, %v539_v14  ;;  %v671_v18 = vpop.xlane.xlu0 %670 }
  0xb5   : > { %v923_v20 = vmul.f32 0.015625, %v671_v18  ;;  %v825_v18 = vsel %vm473_vm0, %v462_v8, 0.0 }
  0xb6   : > { %v1135_v23 = vperm.slane %v863_v16, %v1908_v10  ;;  %v1187_v24 = vperm.slane %v879_v17, %v1908_v10 }
  0xb7   : > { %v1272_v26 = vperm.slane %v923_v20, %v1839_v40 }
  0xb8   : > { %v1137_v27 = vsel %vm1136_vm5, %v1135_v23, %v1133_v54  ;;  %v1922_v28 = vsel %vm1136_vm5, %v1187_v24, %v1186_v55  ;;  %733 = vadd.xlane.f32.xlu1 %v732_v21  ;;  %778 = vadd.xlane.f32.xlu2 %v777_v22  ;;  %v417_v54 = vld [vmem:[%s1735_s11 + $0x240] sm:$0xff]  ;;  %v735_v21 = vsel %vm473_vm0, %v432_v12, 0.0 }
  0xb9   : > { %v1273_v29 = vsel %vm1120_vm1, %v1272_v26, %v1271_v19  ;;  %688 = vadd.xlane.f32.xlu0 %v687_v25  ;;  %v690_v0 = vsel %vm473_vm0, %v417_v54, 0.0  ;;  %v373_v26 = vld [vmem:[%s1735_s11 + $0xe0] sm:$0xff] }
  0xbb   : > { %v629_v32 = vpop.xlane.xlu1 %628  ;;  %v674_v33 = vpop.xlane.xlu2 %673 }
  0xbc   : > { %v909_v38 = vmul.f32 0.015625, %v629_v32  ;;  %v924_v39 = vmul.f32 0.015625, %v674_v33  ;;  %v584_v41 = vpop.xlane.xlu0 %583 }
  0xbd   : > { %v894_v42 = vmul.f32 0.015625, %v584_v41 }
  0xbe   : > { %v1245_v45 = vperm.slane %v909_v38, %v1857_v63  ;;  %v1274_v46 = vperm.slane %v924_v39, %v1836_v37  ;;  %v558_v38 = vsel %vm473_vm0, %v373_v26, 0.0  ;;  %v404_v26 = vld [vmem:[%s1735_s11 + $0x1d8] sm:$0xff] }
  0xbf   : > { %v1216_v48 = vperm.slane %v894_v42, %v1882_v34 }
  0xc0   : > { %v1246_v49 = vsel %vm1128_vm3, %v1245_v45, %v1244_v7  ;;  %v1936_v50 = vsel %vm1124_vm2, %v1274_v46, %v1273_v29  ;;  %508 = vadd.xlane.f32.xlu1 %v507_v43  ;;  %556 = vadd.xlane.f32.xlu2 %v555_v44  ;;  %v447_v7 = vld [vmem:[%s1735_s11 + $0x330] sm:$0xff]  ;;  %v1986_v46 = vadd.s32 4294967240, %v1833_v36 }
  0xc1   : > { %v1217_v51 = vsel %vm1132_vm4, %v1216_v48, %v1215_v9  ;;  %823 = vadd.xlane.f32.xlu0 %v822_v47  ;;  %v780_v17 = vsel %vm473_vm0, %v447_v7, 0.0  ;;  %v418_v47 = vld [vmem:[%s1735_s11 + $0x248] sm:$0xff]  ;;  %v433_v48 = vld [vmem:[%s1735_s11 + $0x2c0] sm:$0xff] }
  0xc3   : > { %v719_v55 = vpop.xlane.xlu1 %718  ;;  %v494_v56 = vpop.xlane.xlu2 %493 }
  0xc4   : > { %v939_v58 = vmul.f32 0.015625, %v719_v55  ;;  %v864_v59 = vmul.f32 0.015625, %v494_v56  ;;  %v716_v60 = vpop.xlane.xlu0 %715 }
  0xc5   : > { %v938_v61 = vmul.f32 0.015625, %v716_v60 }
  0xc6   : > { %v1303_v1 = vperm.slane %v939_v58, %v1839_v40  ;;  %v1139_v2 = vperm.slane %v864_v59, %v1940_v52  ;;  %v738_v59 = vsel %vm473_vm0, %v433_v48, 0.0 }
  0xc7   : > { %v1302_v4 = vperm.slane %v938_v61, %v1833_v36 }
  0xc8   : > { %v1952_v5 = vsel %vm1140_vm6, %v1139_v2, %v1137_v27  ;;  %646 = vadd.xlane.f32.xlu1 %v645_v62  ;;  %691 = vadd.xlane.f32.xlu2 %v690_v0  ;;  %v388_v27 = vld [vmem:[%s1735_s11 + $0x158] sm:$0xff]  ;;  %v648_v62 = vsel %vm473_vm0, %v403_v53, 0.0 }
  0xc9   : > { %v1304_v6 = vsel %vm1120_vm1, %v1303_v1, %v1302_v4  ;;  %601 = vadd.xlane.f32.xlu0 %v600_v3  ;;  %v603_v39 = vsel %vm473_vm0, %v388_v27, 0.0  ;;  %v463_v4 = vld [vmem:[%s1735_s11 + $0x3b0] sm:$0xff] }
  0xcb   : > { %v587_v9 = vpop.xlane.xlu1 %586  ;;  %v632_v11 = vpop.xlane.xlu2 %631 }
  0xcc   : > { %v895_v13 = vmul.f32 0.015625, %v587_v9  ;;  %v910_v14 = vmul.f32 0.015625, %v632_v11  ;;  %v542_v15 = vpop.xlane.xlu0 %541  ;;  %v448_v9 = vld [vmem:[%s1735_s11 + $0x338] sm:$0xff] }
  0xcd   : > { %v880_v16 = vmul.f32 0.015625, %v542_v15 }
  0xce   : > { %v1218_v19 = vperm.slane %v895_v13, %v1908_v10  ;;  %v1247_v20 = vperm.slane %v910_v14, %v1882_v34  ;;  %v828_v14 = vsel %vm473_vm0, %v463_v4, 0.0  ;;  %v359_v4 = vld [vmem:[%s1735_s11 + $0x70] sm:$0xff] }
  0xcf   : > { %v1189_v22 = vperm.slane %v880_v16, %v1940_v52 }
  0xd0   : > { %v1965_v23 = vsel %vm1136_vm5, %v1218_v19, %v1217_v51  ;;  %v1968_v24 = vsel %vm1132_vm4, %v1247_v20, %v1246_v49  ;;  %781 = vadd.xlane.f32.xlu1 %v780_v17  ;;  %826 = vadd.xlane.f32.xlu2 %v825_v18  ;;  %v783_v18 = vsel %vm473_vm0, %v448_v9, 0.0  ;;  %v464_v9 = vld [vmem:[%s1735_s11 + $0x3b8] sm:$0xff] }
  0xd1   : > { %v1190_v25 = vsel %vm1140_vm6, %v1189_v22, %v1922_v28  ;;  %736 = vadd.xlane.f32.xlu0 %v735_v21  ;;  %v510_v28 = vsel %vm473_vm0, %v357_v31, 0.0 }
  0xd3   : > { %v722_v29 = vpop.xlane.xlu1 %721  ;;  %v764_v30 = vpop.xlane.xlu2 %763 }
  0xd4   : > { %v940_v32 = vmul.f32 0.015625, %v722_v29  ;;  %v677_v33 = vpop.xlane.xlu0 %676  ;;  %v954_v44 = vmul.f32 0.015625, %v764_v30  ;;  %v374_v30 = vld [vmem:[%s1735_s11 + $0xe8] sm:$0xff] }
  0xd5   : > { %v925_v35 = vmul.f32 0.015625, %v677_v33 }
  0xd6   : > { %v1305_v41 = vperm.slane %v940_v32, %v1836_v37  ;;  %v1333_v57 = vperm.slane %v954_v44, %v1833_v36  ;;  %v2042_v44 = vadd.s32 4294967232, %v1833_v36 }
  0xd7   : > { %v1276_v42 = vperm.slane %v925_v35, %v1857_v63  ;;  %v651_v35 = vsel %vm473_vm0, %v404_v26, 0.0  ;;  %v420_v26 = vld [vmem:[%s1735_s11 + $0x258] sm:$0xff] }
  0xd8   : > { %v1981_v43 = vsel %vm1124_vm2, %v1305_v41, %v1304_v6  ;;  %559 = vadd.xlane.f32.xlu1 %v558_v38  ;;  %604 = vadd.xlane.f32.xlu2 %v603_v39  ;;  %v358_v6 = vld [vmem:[%s1735_s11 + $0x68] sm:$0xff] }
  0xd9   : > { %v1277_v45 = vsel %vm1128_vm3, %v1276_v42, %v1936_v50  ;;  %511 = vadd.xlane.f32.xlu0 %v510_v28  ;;  %v693_v50 = vsel %vm473_vm0, %v418_v47, 0.0  ;;  %v513_v15 = vsel %vm473_vm0, %v358_v6, 0.0  ;;  %v449_v47 = vld [vmem:[%s1735_s11 + $0x340] sm:$0xff]  ;;  %v375_v6 = vld [vmem:[%s1735_s11 + $0xf0] sm:$0xff] }
  0xdb   : > { %v497_v49 = vpop.xlane.xlu1 %496  ;;  %v545_v51 = vpop.xlane.xlu2 %544 }
  0xdc   : > { %v865_v54 = vmul.f32 0.015625, %v497_v49  ;;  %v881_v55 = vmul.f32 0.015625, %v545_v51  ;;  %v767_v56 = vpop.xlane.xlu0 %766  ;;  %v419_v51 = vld [vmem:[%s1735_s11 + $0x250] sm:$0xff] }
  0xdd   : > { %v955_v58 = vmul.f32 0.015625, %v767_v56 }
  0xde   : > { %v1143_v60 = vperm.slane %v865_v54, %v1986_v46  ;;  %v1191_v61 = vperm.slane %v881_v55, %v1986_v46 }
  0xdf   : > { %v1334_v0 = vperm.slane %v955_v58, %v1839_v40  ;;  %v786_v58 = vsel %vm473_vm0, %v449_v47, 0.0  ;;  %v2101_v47 = vadd.s32 4294967224, %v1833_v36 }
  0xe0   : > { %v2000_v1 = vsel %vm1144_vm7, %v1143_v60, %v1952_v5  ;;  %v2003_v2 = vsel %vm1144_vm7, %v1191_v61, %v1190_v25  ;;  %694 = vadd.xlane.f32.xlu1 %v693_v50  ;;  %739 = vadd.xlane.f32.xlu2 %v738_v59  ;;  %v389_v25 = vld [vmem:[%s1735_s11 + $0x160] sm:$0xff]  ;;  %v696_v60 = vsel %vm473_vm0, %v419_v51, 0.0 }
  0xe1   : > { %v1335_v3 = vsel %vm1120_vm1, %v1334_v0, %v1333_v57  ;;  %649 = vadd.xlane.f32.xlu0 %v648_v62  ;;  %v606_v33 = vsel %vm473_vm0, %v389_v25, 0.0  ;;  %v405_v25 = vld [vmem:[%s1735_s11 + $0x1e0] sm:$0xff] }
  0xe3   : > { %v635_v7 = vpop.xlane.xlu1 %634  ;;  %v680_v8 = vpop.xlane.xlu2 %679 }
  0xe4   : > { %v911_v11 = vmul.f32 0.015625, %v635_v7  ;;  %v926_v12 = vmul.f32 0.015625, %v680_v8  ;;  %v590_v13 = vpop.xlane.xlu0 %589 }
  0xe5   : > { %v896_v5 = vmul.f32 0.015625, %v590_v13  ;;  %v516_v13 = vsel %vm473_vm0, %v359_v4, 0.0  ;;  %v376_v4 = vld [vmem:[%s1735_s11 + $0xf8] sm:$0xff] }
  0xe6   : > { %v1249_v16 = vperm.slane %v911_v11, %v1908_v10  ;;  %v1278_v17 = vperm.slane %v926_v12, %v1882_v34 }
  0xe7   : > { %v1220_v19 = vperm.slane %v896_v5, %v1940_v52 }
  0xe8   : > { %v2017_v20 = vsel %vm1136_vm5, %v1249_v16, %v1968_v24  ;;  %v2020_v21 = vsel %vm1132_vm4, %v1278_v17, %v1277_v45  ;;  %829 = vadd.xlane.f32.xlu1 %v828_v14  ;;  %514 = vadd.xlane.f32.xlu2 %v513_v15  ;;  %v434_v45 = vld [vmem:[%s1735_s11 + $0x2c8] sm:$0xff]  ;;  %v831_v15 = vsel %vm473_vm0, %v464_v9, 0.0  ;;  %v360_v9 = vld [vmem:[%s1735_s11 + $0x78] sm:$0xff] }
  0xe9   : > { %v2024_v22 = vsel %vm1140_vm6, %v1220_v19, %v1965_v23  ;;  %784 = vadd.xlane.f32.xlu0 %v783_v18  ;;  %v561_v23 = vsel %vm473_vm0, %v374_v30, 0.0  ;;  %v390_v30 = vld [vmem:[%s1735_s11 + $0x168] sm:$0xff] }
  0xeb   : > { %v770_v27 = vpop.xlane.xlu1 %769  ;;  %v812_v29 = vpop.xlane.xlu2 %811 }
  0xec   : > { %v956_v31 = vmul.f32 0.015625, %v770_v27  ;;  %v725_v24 = vpop.xlane.xlu0 %724  ;;  %v970_v28 = vmul.f32 0.015625, %v812_v29 }
  0xed   : > { %v941_v32 = vmul.f32 0.015625, %v725_v24 }
  0xee   : > { %v1336_v38 = vperm.slane %v956_v31, %v1836_v37  ;;  %v1364_v56 = vperm.slane %v970_v28, %v1833_v36 }
  0xef   : > { %v1307_v39 = vperm.slane %v941_v32, %v1857_v63 }
  0xf0   : > { %v2035_v41 = vsel %vm1124_vm2, %v1336_v38, %v1335_v3  ;;  %607 = vadd.xlane.f32.xlu1 %v606_v33  ;;  %652 = vadd.xlane.f32.xlu2 %v651_v35  ;;  %v699_v33 = vsel %vm473_vm0, %v420_v26, 0.0  ;;  %v609_v38 = vsel %vm473_vm0, %v390_v30, 0.0  ;;  %v421_v26 = vld [vmem:[%s1735_s11 + $0x260] sm:$0xff] }
  0xf1   : > { %v2039_v42 = vsel %vm1128_vm3, %v1307_v39, %v1981_v43  ;;  %562 = vadd.xlane.f32.xlu0 %v561_v23  ;;  %v741_v43 = vsel %vm473_vm0, %v434_v45, 0.0 }
  0xf3   : > { %v500_v48 = vpop.xlane.xlu1 %499  ;;  %v548_v49 = vpop.xlane.xlu2 %547 }
  0xf4   : > { %v866_v53 = vmul.f32 0.015625, %v500_v48  ;;  %v882_v54 = vmul.f32 0.015625, %v548_v49  ;;  %v815_v55 = vpop.xlane.xlu0 %814  ;;  %v465_v48 = vld [vmem:[%s1735_s11 + $0x3c0] sm:$0xff] }
  0xf5   : > { %v971_v57 = vmul.f32 0.015625, %v815_v55 }
  0xf6   : > { %v1147_v50 = vperm.slane %v866_v53, %v2042_v44  ;;  %v1193_v59 = vperm.slane %v882_v54, %v2042_v44  ;;  %v435_v53 = vld [vmem:[%s1735_s11 + $0x2d0] sm:$0xff] }
  0xf7   : > { %v1365_v61 = vperm.slane %v971_v57, %v1839_v40 }
  0xf8   : > { %v2056_v62 = vsel %vm1148_vm8, %v1147_v50, %v2000_v1  ;;  %v2060_v0 = vsel %vm1148_vm8, %v1193_v59, %v2003_v2  ;;  %742 = vadd.xlane.f32.xlu1 %v741_v43  ;;  %787 = vadd.xlane.f32.xlu2 %v786_v58  ;;  %v564_v2 = vsel %vm473_vm0, %v375_v6, 0.0  ;;  %v744_v50 = vsel %vm473_vm0, %v435_v53, 0.0  ;;  %v391_v6 = vld [vmem:[%s1735_s11 + $0x170] sm:$0xff] }
  0xf9   : > { %v1366_v3 = vsel %vm1120_vm1, %v1365_v61, %v1364_v56  ;;  %697 = vadd.xlane.f32.xlu0 %v696_v60  ;;  %v451_v53 = vld [vmem:[%s1735_s11 + $0x350] sm:$0xff]  ;;  %vm1397_vm1 = vcmask 1042434  }
  0xfb   : > { %v638_v7 = vpop.xlane.xlu1 %637  ;;  %v683_v8 = vpop.xlane.xlu2 %682 }
  0xfc   : > { %v912_v11 = vmul.f32 0.015625, %v638_v7  ;;  %v927_v40 = vmul.f32 0.015625, %v683_v8  ;;  %v593_v1 = vpop.xlane.xlu0 %592 }
  0xfd   : > { %v897_v12 = vmul.f32 0.015625, %v593_v1 }
  0xfe   : > { %v1251_v5 = vperm.slane %v912_v11, %v1940_v52  ;;  %v1280_v14 = vperm.slane %v927_v40, %v1908_v10 }
  0xff   : > { %v1222_v16 = vperm.slane %v897_v12, %v1986_v46  ;;  %v567_v12 = vsel %vm473_vm0, %v376_v4, 0.0  ;;  %v422_v4 = vld [vmem:[%s1735_s11 + $0x268] sm:$0xff] }
 0x100   : > { %v2074_v17 = vsel %vm1140_vm6, %v1251_v5, %v2017_v20  ;;  %v2078_v18 = vsel %vm1136_vm5, %v1280_v14, %v2020_v21  ;;  %517 = vadd.xlane.f32.xlu1 %v516_v13  ;;  %565 = vadd.xlane.f32.xlu2 %v564_v2  ;;  %v654_v21 = vsel %vm473_vm0, %v405_v25, 0.0  ;;  %v612_v13 = vsel %vm473_vm0, %v391_v6, 0.0  ;;  %v437_v6 = vld [vmem:[%s1735_s11 + $0x2e0] sm:$0xff] }
 0x101   : > { %v1223_v19 = vsel %vm1144_vm7, %v1222_v16, %v2024_v22  ;;  %832 = vadd.xlane.f32.xlu0 %v831_v15  ;;  %v519_v5 = vsel %vm473_vm0, %v360_v9, 0.0  ;;  %v2140_v25 = vadd.s32 4294967216, %v1833_v36  ;;  %v407_v9 = vld [vmem:[%s1735_s11 + $0x1f0] sm:$0xff] }
 0x103   : > { %v773_v27 = vpop.xlane.xlu1 %772  ;;  %v818_v29 = vpop.xlane.xlu2 %817 }
 0x104   : > { %v957_v31 = vmul.f32 0.015625, %v773_v27  ;;  %v972_v24 = vmul.f32 0.015625, %v818_v29  ;;  %v728_v20 = vpop.xlane.xlu0 %727  ;;  %v436_v27 = vld [vmem:[%s1735_s11 + $0x2d8] sm:$0xff] }
 0x105   : > { %v942_v32 = vmul.f32 0.015625, %v728_v20 }
 0x106   : > { %v1338_v35 = vperm.slane %v957_v31, %v1857_v63  ;;  %v1367_v22 = vperm.slane %v972_v24, %v1836_v37  ;;  %v450_v37 = vld [vmem:[%s1735_s11 + $0x348] sm:$0xff] }
 0x107   : > { %v1309_v23 = vperm.slane %v942_v32, %v1882_v34  ;;  %v789_v57 = vsel %vm473_vm0, %v450_v37, 0.0  ;;  %v406_v31 = vld [vmem:[%s1735_s11 + $0x1e8] sm:$0xff] }
 0x108   : > { %v2093_v39 = vsel %vm1128_vm3, %v1338_v35, %v2035_v41  ;;  %v2096_v28 = vsel %vm1124_vm2, %v1367_v22, %v1366_v3  ;;  %655 = vadd.xlane.f32.xlu1 %v654_v21  ;;  %700 = vadd.xlane.f32.xlu2 %v699_v33  ;;  %v702_v21 = vsel %vm473_vm0, %v421_v26, 0.0  ;;  %v657_v22 = vsel %vm473_vm0, %v406_v31, 0.0 }
 0x109   : > { %v1310_v45 = vsel %vm1132_vm4, %v1309_v23, %v2039_v42  ;;  %610 = vadd.xlane.f32.xlu0 %v609_v38  ;;  %v834_v42 = vsel %vm473_vm0, %v465_v48, 0.0  ;;  %v392_v48 = vld [vmem:[%s1735_s11 + $0x178] sm:$0xff]  ;;  %v2197_v26 = vadd.s32 4294967208, %v1833_v36  ;;  %vm1399_vm2 = vcmask 1043459  }
 0x10b   : > { %v551_v49 = vpop.xlane.xlu1 %550  ;;  %v596_v51 = vpop.xlane.xlu2 %595 }
 0x10c   : > { %v883_v54 = vmul.f32 0.015625, %v551_v49  ;;  %v898_v41 = vmul.f32 0.015625, %v596_v51  ;;  %v503_v55 = vpop.xlane.xlu0 %502 }
 0x10d   : > { %v867_v56 = vmul.f32 0.015625, %v503_v55 }
 0x10e   : > { %v1195_v43 = vperm.slane %v883_v54, %v2101_v47  ;;  %v1224_v58 = vperm.slane %v898_v41, %v2042_v44 }
 0x10f   : > { %v1151_v59 = vperm.slane %v867_v56, %v2101_v47 }
 0x110   : > { %v2114_v60 = vsel %vm1152_vm9, %v1195_v43, %v2060_v0  ;;  %v2117_v61 = vsel %vm1148_vm8, %v1224_v58, %v1223_v19  ;;  %790 = vadd.xlane.f32.xlu1 %v789_v57  ;;  %835 = vadd.xlane.f32.xlu2 %v834_v42  ;;  %v615_v57 = vsel %vm473_vm0, %v392_v48, 0.0  ;;  %v792_v43 = vsel %vm473_vm0, %v451_v53, 0.0  ;;  %v438_v48 = vld [vmem:[%s1735_s11 + $0x2e8] sm:$0xff] }
 0x111   : > { %v1153_v3 = vsel %vm1152_vm9, %v1151_v59, %v2056_v62  ;;  %745 = vadd.xlane.f32.xlu0 %v744_v50 }
 0x113   : > { %v686_v7 = vpop.xlane.xlu1 %685  ;;  %v731_v8 = vpop.xlane.xlu2 %730 }
 0x114   : > { %v928_v11 = vmul.f32 0.015625, %v686_v7  ;;  %v943_v40 = vmul.f32 0.015625, %v731_v8  ;;  %v641_v1 = vpop.xlane.xlu0 %640 }
 0x115   : > { %v913_v0 = vmul.f32 0.015625, %v641_v1 }
 0x116   : > { %v1282_v2 = vperm.slane %v928_v11, %v1940_v52  ;;  %v1311_v62 = vperm.slane %v943_v40, %v1908_v10 }
 0x117   : > { %v1253_v14 = vperm.slane %v913_v0, %v1986_v46  ;;  %v705_v0 = vsel %vm473_vm0, %v422_v4, 0.0  ;;  %v424_v4 = vld [vmem:[%s1735_s11 + $0x278] sm:$0xff] }
 0x118   : > { %v2132_v15 = vsel %vm1140_vm6, %v1282_v2, %v2078_v18  ;;  %v2135_v16 = vsel %vm1136_vm5, %v1311_v62, %v1310_v45  ;;  %568 = vadd.xlane.f32.xlu1 %v567_v12  ;;  %613 = vadd.xlane.f32.xlu2 %v612_v13  ;;  %v750_v12 = vsel %vm473_vm0, %v437_v6, 0.0  ;;  %v660_v2 = vsel %vm473_vm0, %v407_v9, 0.0  ;;  %v439_v6 = vld [vmem:[%s1735_s11 + $0x2f0] sm:$0xff]  ;;  %v468_v9 = vld [vmem:[%s1735_s11 + $0x3d8] sm:$0xff] }
 0x119   : > { %v1254_v19 = vsel %vm1144_vm7, %v1253_v14, %v2074_v17  ;;  %520 = vadd.xlane.f32.xlu0 %v519_v5  ;;  %v747_v17 = vsel %vm473_vm0, %v436_v27, 0.0  ;;  %v467_v27 = vld [vmem:[%s1735_s11 + $0x3d0] sm:$0xff] }
 0x11b   : > { %v821_v29 = vpop.xlane.xlu1 %820  ;;  %v506_v30 = vpop.xlane.xlu2 %505 }
 0x11c   : > { %v973_v24 = vmul.f32 0.015625, %v821_v29  ;;  %v868_v18 = vmul.f32 0.015625, %v506_v30  ;;  %v776_v20 = vpop.xlane.xlu0 %775  ;;  %v408_v29 = vld [vmem:[%s1735_s11 + $0x1f8] sm:$0xff] }
 0x11d   : > { %v958_v32 = vmul.f32 0.015625, %v776_v20 }
 0x11e   : > { %v1369_v33 = vperm.slane %v973_v24, %v1857_v63  ;;  %v1155_v35 = vperm.slane %v868_v18, %v2140_v25  ;;  %v466_v63 = vld [vmem:[%s1735_s11 + $0x3c8] sm:$0xff]  ;;  %v452_v24 = vld [vmem:[%s1735_s11 + $0x358] sm:$0xff] }
 0x11f   : > { %v1340_v38 = vperm.slane %v958_v32, %v1882_v34  ;;  %v837_v56 = vsel %vm473_vm0, %v466_v63, 0.0 }
 0x120   : > { %v2153_v23 = vsel %vm1128_vm3, %v1369_v33, %v2096_v28  ;;  %v2156_v45 = vsel %vm1156_vm10, %v1155_v35, %v1153_v3  ;;  %703 = vadd.xlane.f32.xlu1 %v702_v21  ;;  %748 = vadd.xlane.f32.xlu2 %v747_v17  ;;  %v840_v21 = vsel %vm473_vm0, %v467_v27, 0.0  ;;  %v795_v35 = vsel %vm473_vm0, %v452_v24, 0.0  ;;  %v454_v24 = vld [vmem:[%s1735_s11 + $0x368] sm:$0xff] }
 0x121   : > { %v1341_v37 = vsel %vm1132_vm4, %v1340_v38, %v2093_v39  ;;  %658 = vadd.xlane.f32.xlu0 %v657_v22  ;;  %v2254_v27 = vadd.s32 4294967200, %v1833_v36  ;;  %vm1401_vm3 = vcmask 1044484  }
 0x123   : > { %v599_v49 = vpop.xlane.xlu1 %598  ;;  %v644_v51 = vpop.xlane.xlu2 %643 }
 0x124   : > { %v899_v54 = vmul.f32 0.015625, %v599_v49  ;;  %v914_v41 = vmul.f32 0.015625, %v644_v51  ;;  %v554_v28 = vpop.xlane.xlu0 %553  ;;  %v453_v49 = vld [vmem:[%s1735_s11 + $0x360] sm:$0xff] }
 0x125   : > { %v884_v55 = vmul.f32 0.015625, %v554_v28 }
 0x126   : > { %v1226_v42 = vperm.slane %v899_v54, %v2101_v47  ;;  %v1255_v39 = vperm.slane %v914_v41, %v2042_v44  ;;  %v423_v54 = vld [vmem:[%s1735_s11 + $0x270] sm:$0xff] }
 0x127   : > { %v1197_v58 = vperm.slane %v884_v55, %v2140_v25  ;;  %v753_v55 = vsel %vm473_vm0, %v438_v48, 0.0  ;;  %v470_v48 = vld [vmem:[%s1735_s11 + $0x3e8] sm:$0xff] }
 0x128   : > { %v2171_v50 = vsel %vm1152_vm9, %v1226_v42, %v2117_v61  ;;  %v2174_v59 = vsel %vm1148_vm8, %v1255_v39, %v1254_v19  ;;  %838 = vadd.xlane.f32.xlu1 %v837_v56  ;;  %616 = vadd.xlane.f32.xlu2 %v615_v57  ;;  %v798_v56 = vsel %vm473_vm0, %v453_v49, 0.0  ;;  %v708_v42 = vsel %vm473_vm0, %v423_v54, 0.0  ;;  %v456_v49 = vld [vmem:[%s1735_s11 + $0x378] sm:$0xff]  ;;  %v455_v54 = vld [vmem:[%s1735_s11 + $0x370] sm:$0xff] }
 0x129   : > { %v1198_v3 = vsel %vm1156_vm10, %v1197_v58, %v2114_v60  ;;  %793 = vadd.xlane.f32.xlu0 %v792_v43 }
 0x12b   : > { %v734_v7 = vpop.xlane.xlu1 %733  ;;  %v779_v8 = vpop.xlane.xlu2 %778 }
 0x12c   : > { %v944_v11 = vmul.f32 0.015625, %v734_v7  ;;  %v959_v40 = vmul.f32 0.015625, %v779_v8  ;;  %v689_v1 = vpop.xlane.xlu0 %688 }
 0x12d   : > { %v929_v61 = vmul.f32 0.015625, %v689_v1 }
 0x12e   : > { %v1313_v13 = vperm.slane %v944_v11, %v1940_v52  ;;  %v1342_v60 = vperm.slane %v959_v40, %v1908_v10 }
 0x12f   : > { %v1284_v62 = vperm.slane %v929_v61, %v1986_v46  ;;  %v711_v61 = vsel %vm473_vm0, %v424_v4, 0.0  ;;  %v2285_v4 = vadd.s32 4294967192, %v1833_v36 }
 0x130   : > { %v2189_v5 = vsel %vm1140_vm6, %v1313_v13, %v2135_v16  ;;  %v2192_v14 = vsel %vm1136_vm5, %v1342_v60, %v1341_v37  ;;  %706 = vadd.xlane.f32.xlu1 %v705_v0  ;;  %751 = vadd.xlane.f32.xlu2 %v750_v12  ;;  %v756_v0 = vsel %vm473_vm0, %v439_v6, 0.0  ;;  %v843_v13 = vsel %vm473_vm0, %v468_v9, 0.0  ;;  %v472_v6 = vld [vmem:[%s1735_s11 + $0x3f8] sm:$0xff]  ;;  %v471_v9 = vld [vmem:[%s1735_s11 + $0x3f0] sm:$0xff] }
 0x131   : > { %v1285_v19 = vsel %vm1144_vm7, %v1284_v62, %v2132_v15  ;;  %661 = vadd.xlane.f32.xlu0 %v660_v2  ;;  %v663_v15 = vsel %vm473_vm0, %v408_v29, 0.0  ;;  %v440_v29 = vld [vmem:[%s1735_s11 + $0x2f8] sm:$0xff] }
 0x133   : > { %v509_v30 = vpop.xlane.xlu1 %508  ;;  %v557_v31 = vpop.xlane.xlu2 %556 }
 0x134   : > { %v869_v18 = vmul.f32 0.015625, %v509_v30  ;;  %v885_v16 = vmul.f32 0.015625, %v557_v31  ;;  %v824_v20 = vpop.xlane.xlu0 %823 }
 0x135   : > { %v974_v32 = vmul.f32 0.015625, %v824_v20 }
 0x136   : > { %v1159_v17 = vperm.slane %v869_v18, %v2197_v26  ;;  %v1199_v33 = vperm.slane %v885_v16, %v2197_v26 }
 0x137   : > { %v1371_v22 = vperm.slane %v974_v32, %v1882_v34 }
 0x138   : > { %v2210_v38 = vsel %vm1160_vm11, %v1159_v17, %v2156_v45  ;;  %v2213_v37 = vsel %vm1160_vm11, %v1199_v33, %v1198_v3  ;;  %841 = vadd.xlane.f32.xlu1 %v840_v21  ;;  %664 = vadd.xlane.f32.xlu2 %v663_v15  ;;  %v801_v17 = vsel %vm473_vm0, %v454_v24, 0.0 }
 0x139   : > { %v1372_v63 = vsel %vm1132_vm4, %v1371_v22, %v2153_v23  ;;  %796 = vadd.xlane.f32.xlu0 %v795_v35  ;;  %vm1403_vm4 = vcmask 1045509  }
 0x13b   : > { %v647_v51 = vpop.xlane.xlu1 %646  ;;  %v692_v53 = vpop.xlane.xlu2 %691 }
 0x13c   : > { %v915_v41 = vmul.f32 0.015625, %v647_v51  ;;  %v930_v34 = vmul.f32 0.015625, %v692_v53  ;;  %v602_v45 = vpop.xlane.xlu0 %601 }
 0x13d   : > { %v900_v28 = vmul.f32 0.015625, %v602_v45 }
 0x13e   : > { %v1257_v57 = vperm.slane %v915_v41, %v2101_v47  ;;  %v1286_v23 = vperm.slane %v930_v34, %v2042_v44 }
 0x13f   : > { %v1228_v39 = vperm.slane %v900_v28, %v2140_v25 }
 0x140   : > { %v2228_v43 = vsel %vm1152_vm9, %v1257_v57, %v2174_v59  ;;  %v2231_v58 = vsel %vm1148_vm8, %v1286_v23, %v1285_v19  ;;  %754 = vadd.xlane.f32.xlu1 %v753_v55  ;;  %799 = vadd.xlane.f32.xlu2 %v798_v56  ;;  %v807_v55 = vsel %vm473_vm0, %v456_v49, 0.0  ;;  %v804_v57 = vsel %vm473_vm0, %v455_v54, 0.0 }
 0x141   : > { %v1229_v3 = vsel %vm1156_vm10, %v1228_v39, %v2171_v50  ;;  %709 = vadd.xlane.f32.xlu0 %v708_v42 }
 0x143   : > { %v782_v7 = vpop.xlane.xlu1 %781  ;;  %v827_v8 = vpop.xlane.xlu2 %826 }
 0x144   : > { %v960_v11 = vmul.f32 0.015625, %v782_v7  ;;  %v975_v40 = vmul.f32 0.015625, %v827_v8  ;;  %v737_v1 = vpop.xlane.xlu0 %736 }
 0x145   : > { %v945_v59 = vmul.f32 0.015625, %v737_v1 }
 0x146   : > { %v1344_v12 = vperm.slane %v960_v11, %v1940_v52  ;;  %v1373_v50 = vperm.slane %v975_v40, %v1908_v10  ;;  %v469_v10 = vld [vmem:[%s1735_s11 + $0x3e0] sm:$0xff] }
 0x147   : > { %v1315_v60 = vperm.slane %v945_v59, %v1986_v46  ;;  %v846_v32 = vsel %vm473_vm0, %v469_v10, 0.0  ;;  %v855_v59 = vsel %vm473_vm0, %v472_v6, 0.0 }
 0x148   : > { %v2246_v2 = vsel %vm1140_vm6, %v1344_v12, %v2192_v14  ;;  %v2249_v62 = vsel %vm1136_vm5, %v1373_v50, %v1372_v63  ;;  %712 = vadd.xlane.f32.xlu1 %v711_v61  ;;  %757 = vadd.xlane.f32.xlu2 %v756_v0  ;;  %vm1405_vm5 = vcmask 1046534  }
 0x149   : > { %v1316_v19 = vsel %vm1144_vm7, %v1315_v60, %v2189_v5  ;;  %844 = vadd.xlane.f32.xlu0 %v843_v13  ;;  %v759_v5 = vsel %vm473_vm0, %v440_v29, 0.0 }
 0x14b   : > { %v560_v30 = vpop.xlane.xlu1 %559  ;;  %v605_v31 = vpop.xlane.xlu2 %604 }
 0x14c   : > { %v886_v18 = vmul.f32 0.015625, %v560_v30  ;;  %v901_v14 = vmul.f32 0.015625, %v605_v31  ;;  %v512_v16 = vpop.xlane.xlu0 %511 }
 0x14d   : > { %v870_v20 = vmul.f32 0.015625, %v512_v16 }
 0x14e   : > { %v1201_v21 = vperm.slane %v886_v18, %v2254_v27  ;;  %v1230_v15 = vperm.slane %v901_v14, %v2197_v26 }
 0x14f   : > { %v1163_v33 = vperm.slane %v870_v20, %v2254_v27 }
 0x150   : > { %v1202_v35 = vsel %vm1164_vm12, %v1201_v21, %v2213_v37  ;;  %v1231_v22 = vsel %vm1160_vm11, %v1230_v15, %v1229_v3  ;;  %847 = vadd.xlane.f32.xlu1 %v846_v32  ;;  %760 = vadd.xlane.f32.xlu2 %v759_v5  ;;  %v849_v37 = vsel %vm473_vm0, %v470_v48, 0.0 }
 0x151   : > { %v1165_v63 = vsel %vm1164_vm12, %v1163_v33, %v2210_v38  ;;  %802 = vadd.xlane.f32.xlu0 %v801_v17 }
 0x153   : > { %v695_v51 = vpop.xlane.xlu1 %694  ;;  %v740_v53 = vpop.xlane.xlu2 %739 }
 0x154   : > { %v931_v41 = vmul.f32 0.015625, %v695_v51  ;;  %v946_v34 = vmul.f32 0.015625, %v740_v53  ;;  %v650_v45 = vpop.xlane.xlu0 %649 }
 0x155   : > { %v916_v28 = vmul.f32 0.015625, %v650_v45 }
 0x156   : > { %v1288_v56 = vperm.slane %v931_v41, %v2101_v47  ;;  %v1317_v38 = vperm.slane %v946_v34, %v2042_v44 }
 0x157   : > { %v1259_v23 = vperm.slane %v916_v28, %v2140_v25 }
 0x158   : > { %v1289_v42 = vsel %vm1152_vm9, %v1288_v56, %v2231_v58  ;;  %v1318_v39 = vsel %vm1148_vm8, %v1317_v38, %v1316_v19  ;;  %850 = vadd.xlane.f32.xlu1 %v849_v37  ;;  %808 = vadd.xlane.f32.xlu2 %v807_v55 }
 0x159   : > { %v1260_v3 = vsel %vm1156_vm10, %v1259_v23, %v2228_v43  ;;  %805 = vadd.xlane.f32.xlu0 %v804_v57  ;;  %v852_v43 = vsel %vm473_vm0, %v471_v9, 0.0  ;;  %vm1395_vm0 = vcmask 1041409  }
 0x15b   : > { %v830_v7 = vpop.xlane.xlu1 %829  ;;  %v515_v8 = vpop.xlane.xlu2 %514 }
 0x15c   : > { %v976_v11 = vmul.f32 0.015625, %v830_v7  ;;  %v871_v40 = vmul.f32 0.015625, %v515_v8  ;;  %v785_v1 = vpop.xlane.xlu0 %784 }
 0x15d   : > { %v961_v58 = vmul.f32 0.015625, %v785_v1 }
 0x15e   : > { %v1375_v61 = vperm.slane %v976_v11, %v1940_v52  ;;  %v1167_v0 = vperm.slane %v871_v40, %v2285_v4 }
 0x15f   : > { %v1346_v12 = vperm.slane %v961_v58, %v1986_v46 }
 0x160   : > { %v1376_v50 = vsel %vm1140_vm6, %v1375_v61, %v2249_v62  ;;  %v1169_v13 = vsel %vm1168_vm13, %v1167_v0, %v1165_v63  ;;  %856 = vadd.xlane.f32.xlu1 %v855_v59  ;;  %vm1407_vm6 = vcmask 1047559  }
 0x161   : > { %v1347_v60 = vsel %vm1144_vm7, %v1346_v12, %v2246_v2  ;;  %853 = vadd.xlane.f32.xlu0 %v852_v43 }
 0x163   : > { %v608_v19 = vpop.xlane.xlu1 %607  ;;  %v653_v10 = vpop.xlane.xlu2 %652 }
 0x164   : > { %v902_v29 = vmul.f32 0.015625, %v608_v19  ;;  %v917_v52 = vmul.f32 0.015625, %v653_v10  ;;  %v563_v30 = vpop.xlane.xlu0 %562 }
 0x165   : > { %v887_v31 = vmul.f32 0.015625, %v563_v30  ;;  %v2343_v30 = vadd.s32 4294967176, %v1833_v36 }
 0x166   : > { %v1232_v24 = vperm.slane %v902_v29, %v2254_v27  ;;  %v1261_v18 = vperm.slane %v917_v52, %v2197_v26 }
 0x167   : > { %v1203_v14 = vperm.slane %v887_v31, %v2285_v4 }
 0x168   : > { %v1233_v62 = vsel %vm1164_vm12, %v1232_v24, %v1231_v22  ;;  %v1262_v16 = vsel %vm1160_vm11, %v1261_v18, %v1260_v3 }
 0x169   : > { %v1204_v20 = vsel %vm1168_vm13, %v1203_v14, %v1202_v35  ;;  %v2312_v35 = vadd.s32 4294967184, %v1833_v36 }
 0x16b   : > { %v743_v2 = vpop.xlane.xlu1 %742  ;;  %v788_v32 = vpop.xlane.xlu2 %787 }
 0x16c   : > { %v947_v5 = vmul.f32 0.015625, %v743_v2  ;;  %v962_v21 = vmul.f32 0.015625, %v788_v32  ;;  %v698_v15 = vpop.xlane.xlu0 %697 }
 0x16d   : > { %v932_v17 = vmul.f32 0.015625, %v698_v15 }
 0x16e   : > { %v1319_v33 = vperm.slane %v947_v5, %v2101_v47  ;;  %v1348_v63 = vperm.slane %v962_v21, %v2042_v44 }
 0x16f   : > { %v1290_v48 = vperm.slane %v932_v17, %v2140_v25 }
 0x170   : > { %v1320_v49 = vsel %vm1152_vm9, %v1319_v33, %v1318_v39  ;;  %v1349_v22 = vsel %vm1148_vm8, %v1348_v63, %v1347_v60 }
 0x171   : > { %v1291_v51 = vsel %vm1156_vm10, %v1290_v48, %v1289_v42 }
 0x173   : > { %v518_v53 = vpop.xlane.xlu1 %517  ;;  %v566_v54 = vpop.xlane.xlu2 %565 }
 0x174   : > { %v872_v41 = vmul.f32 0.015625, %v518_v53  ;;  %v888_v34 = vmul.f32 0.015625, %v566_v54  ;;  %v833_v45 = vpop.xlane.xlu0 %832 }
 0x175   : > { %v977_v28 = vmul.f32 0.015625, %v833_v45  ;;  %v1424_v45 = vld [vmem:[%s2579_s3 + $0x68] sm:$0xff] }
 0x176   : > { %v1171_v37 = vperm.slane %v872_v41, %v2312_v35  ;;  %v1205_v55 = vperm.slane %v888_v34, %v2312_v35  ;;  %v1425_v41 = vld [vmem:[%s2579_s3 + $0x70] sm:$0xff] }
 0x177   : > { %v1377_v56 = vperm.slane %v977_v28, %v1986_v46 }
 0x178   : > { %v1173_v38 = vsel %vm1172_vm14, %v1171_v37, %v1169_v13  ;;  %v1206_v57 = vsel %vm1172_vm14, %v1205_v55, %v1204_v20 }
 0x179   : > { %v1378_v23 = vsel %vm1144_vm7, %v1377_v56, %v1376_v50  ;;  %v1423_v56 = vld [vmem:[%s2579_s3 + $0x60] sm:$0xff]  ;;  %vm1460_vm7 = vcmask 261120  }
 0x17b   : > { %v656_v42 = vpop.xlane.xlu1 %655  ;;  %v701_v39 = vpop.xlane.xlu2 %700 }
 0x17c   : > { %v918_v3 = vmul.f32 0.015625, %v656_v42  ;;  %v933_v6 = vmul.f32 0.015625, %v701_v39  ;;  %v611_v7 = vpop.xlane.xlu0 %610  ;;  %v1421_v42 = vld [vmem:[%s2579_s3 + $0x50] sm:$0xff]  ;;  %v1420_v39 = vld [vmem:[%s2579_s3 + $0x48] sm:$0xff] }
 0x17d   : > { %v903_v8 = vmul.f32 0.015625, %v611_v7 }
 0x17e   : > { %v1263_v9 = vperm.slane %v918_v3, %v2254_v27  ;;  %v1292_v11 = vperm.slane %v933_v6, %v2197_v26 }
 0x17f   : > { %v1234_v40 = vperm.slane %v903_v8, %v2285_v4 }
 0x180   : > { %v2324_v46 = vsel %vm1164_vm12, %v1263_v9, %v1262_v16  ;;  %v2327_v1 = vsel %vm1160_vm11, %v1292_v11, %v1291_v51  ;;  %v1426_v51 = vld [vmem:[%s2579_s3 + $0x78] sm:$0xff] }
 0x181   : > { %v1235_v58 = vsel %vm1168_vm13, %v1234_v40, %v1233_v62  ;;  %1431 = vmatpush.msra.mxu0 %v1426_v51  ;;  %v1419_v40 = vld [vmem:[%s2579_s3 + $0x40] sm:$0xff] }
 0x183   : > { %v791_v59 = vpop.xlane.xlu1 %790  ;;  %v836_v61 = vpop.xlane.xlu2 %835  ;;  %1432 = vmatpush.msra.mxu0 %v1425_v41 }
 0x184   : > { %v963_v0 = vmul.f32 0.015625, %v791_v59  ;;  %v978_v43 = vmul.f32 0.015625, %v836_v61  ;;  %v746_v12 = vpop.xlane.xlu0 %745  ;;  %v1418_v61 = vld [vmem:[%s2579_s3 + $0x38] sm:$0xff] }
 0x185   : > { %v948_v50 = vmul.f32 0.015625, %v746_v12  ;;  %1433 = vmatpush.msra.mxu0 %v1424_v45  ;;  %v1417_v12 = vld [vmem:[%s2579_s3 + $0x30] sm:$0xff] }
 0x186   : > { %v1350_v13 = vperm.slane %v963_v0, %v2101_v47  ;;  %v1379_v60 = vperm.slane %v978_v43, %v2042_v44 }
 0x187   : > { %v1321_v19 = vperm.slane %v948_v50, %v2140_v25  ;;  %1434 = vmatpush.msra.mxu0 %v1423_v56 }
 0x188   : > { %v2334_v10 = vsel %vm1152_vm9, %v1350_v13, %v1349_v22  ;;  %v2337_v29 = vsel %vm1148_vm8, %v1379_v60, %v1378_v23  ;;  %vm1557_vm8 = vcmask 15360  }
 0x189   : > { %v2340_v52 = vsel %vm1156_vm10, %v1321_v19, %v1320_v49 }
 0x18b   : > { %v569_v31 = vpop.xlane.xlu1 %568  ;;  %v614_v24 = vpop.xlane.xlu2 %613 }
 0x18c   : > { %v889_v18 = vmul.f32 0.015625, %v569_v31  ;;  %v521_v14 = vpop.xlane.xlu0 %520  ;;  %v904_v15 = vmul.f32 0.015625, %v614_v24  ;;  %v1415_v31 = vld [vmem:[%s2579_s3 + $0x20] sm:$0xff] }
 0x18d   : > { %v873_v44 = vmul.f32 0.015625, %v521_v14  ;;  %v1414_v14 = vld [vmem:[%s2579_s3 + $0x18] sm:$0xff] }
 0x18e   : > { %v1207_v62 = vperm.slane %v889_v18, %v2343_v30  ;;  %v1236_v17 = vperm.slane %v904_v15, %v2312_v35 }
 0x18f   : > { %v1175_v16 = vperm.slane %v873_v44, %v2343_v30 }
 0x190   : > { %v1208_v20 = vsel %vm1176_vm15, %v1207_v62, %v1206_v57  ;;  %v1237_v53 = vsel %vm1172_vm14, %v1236_v17, %v1235_v58  ;;  %v1422_v57 = vld [vmem:[%s2579_s3 + $0x58] sm:$0xff]  ;;  %v1413_v62 = vld [vmem:[%s2579_s3 + $0x10] sm:$0xff] }
 0x191   : > { %v1177_v2 = vsel %vm1176_vm15, %v1175_v16, %v1173_v38  ;;  %1435 = vmatpush.msra.mxu0 %v1422_v57 }
 0x192   : > { %v1396_v32 = vsel %vm1395_vm0, %v1208_v20, %v1177_v2  ;;  %v1412_v20 = vld [vmem:[%s2579_s3 + $0x8] sm:$0xff] }
 0x193   : > { %v704_v5 = vpop.xlane.xlu1 %703  ;;  %v2349_v21 = vpop.xlane.xlu2 %748  ;;  %1436 = vmatpush.msra.mxu0 %v1421_v42 }
 0x194   : > { %v659_v36 = vpop.xlane.xlu0 %658  ;;  %v934_v24 = vmul.f32 0.015625, %v704_v5  ;;  %v949_v17 = vmul.f32 0.015625, %v2349_v21  ;;  %v1459_v21 = vld [vmem:[%s2581_s5 + $0x38] sm:$0xff] }
 0x195   : > { %v919_v38 = vmul.f32 0.015625, %v659_v36  ;;  %1437 = vmatpush.msra.mxu0 %v1420_v39  ;;  %1496 = vmatpush.msra.mxu2 %v1459_v21  ;;  %v2484_v21 = vld [vmem:[%s331_s13] sm:$0xff] }
 0x196   : > { %v1294_v16 = vperm.slane %v934_v24, %v2254_v27 }
 0x197   : > { %v1265_v3 = vperm.slane %v919_v38, %v2285_v4  ;;  %1438 = vmatpush.msra.mxu0 %v1419_v40 }
 0x199   : > { %v1266_v58 = vsel %vm1168_vm13, %v1265_v3, %v2324_v46  ;;  %1439 = vmatpush.msra.mxu0 %v1418_v61  ;;  %v1416_v46 = vld [vmem:[%s2579_s3 + $0x28] sm:$0xff] }
 0x19b   : > { %v2352_v33 = vpop.xlane.xlu1 %838  ;;  %v617_v63 = vpop.xlane.xlu2 %616  ;;  %1440 = vmatpush.msra.mxu0 %v1417_v12 }
 0x19c   : > { %v905_v48 = vmul.f32 0.015625, %v617_v63  ;;  %v2354_v49 = vpop.xlane.xlu0 %793 }
 0x19d   : > { %1441 = vmatpush.msra.mxu0 %v1416_v46 }
 0x19e   : > { %v1238_v22 = vperm.slane %v905_v48, %v2343_v30 }
 0x19f   : > { %1442 = vmatpush.msra.mxu0 %v1415_v31 }
 0x1a0   : > { %v1239_v54 = vsel %vm1176_vm15, %v1238_v22, %v1237_v53  ;;  %v1295_v22 = vsel %vm1164_vm12, %v1294_v16, %v2327_v1  ;;  %v1323_v1 = vperm.slane %v949_v17, %v2197_v26 }
 0x1a1   : > { %v1398_v34 = vsel %vm1397_vm1, %v1239_v54, %v1396_v32  ;;  %1443 = vmatpush.msra.mxu0 %v1414_v14  ;;  %v1411_v32 = vld [vmem:[%s2579_s3] sm:$0xff] }
 0x1a2   : > { %v1324_v39 = vsel %vm1160_vm11, %v1323_v1, %v2340_v52 }
 0x1a3   : > { %v707_v28 = vpop.xlane.xlu1 %706  ;;  %v752_v37 = vpop.xlane.xlu2 %751  ;;  %1444 = vmatpush.msra.mxu0 %v1413_v62 }
 0x1a4   : > { %v662_v55 = vpop.xlane.xlu0 %661  ;;  %v935_v18 = vmul.f32 0.015625, %v707_v28  ;;  %v950_v51 = vmul.f32 0.015625, %v752_v37 }
 0x1a5   : > { %v920_v23 = vmul.f32 0.015625, %v662_v55  ;;  %1445 = vmatpush.msra.mxu0 %v1412_v20 }
 0x1a6   : > { %v1296_v2 = vperm.slane %v935_v18, %v2285_v4  ;;  %v1325_v55 = vperm.slane %v950_v51, %v2254_v27 }
 0x1a7   : > { %v1267_v6 = vperm.slane %v920_v23, %v2312_v35  ;;  %1446 = vmatpush.msra.mxu0 %v1411_v32 }
 0x1a8   : > { %v1297_v53 = vsel %vm1168_vm13, %v1296_v2, %v1295_v22 }
 0x1a9   : > { %v1268_v0 = vsel %vm1172_vm14, %v1267_v6, %v1266_v58 }
 0x1ab   : > { %v2382_v7 = vpop.xlane.xlu1 %841  ;;  %v665_v8 = vpop.xlane.xlu2 %664 }
 0x1ac   : > { %v921_v9 = vmul.f32 0.015625, %v665_v8  ;;  %v2384_v11 = vpop.xlane.xlu0 %796  ;;  %v964_v8 = vmul.f32 0.015625, %v2354_v49  ;;  %v980_v14 = vmul.f32 0.015625, %v2382_v7 }
 0x1ad   : > { %v965_v40 = vmul.f32 0.015625, %v2384_v11 }
 0x1ae   : > { %v1269_v59 = vperm.slane %v921_v9, %v2343_v30  ;;  %v1326_v9 = vsel %vm1164_vm12, %v1325_v55, %v1324_v39  ;;  %v1352_v12 = vperm.slane %v964_v8, %v2140_v25  ;;  %v1453_v39 = vld [vmem:[%s2581_s5 + $0x8] sm:$0xff] }
 0x1b0   : > { %v1270_v43 = vsel %vm1176_vm15, %v1269_v59, %v1268_v0  ;;  %v1353_v18 = vsel %vm1156_vm10, %v1352_v12, %v2334_v10  ;;  %v1525_v12 = vld [vmem:[%s2582_s6 + $0x40] sm:$0xff] }
 0x1b1   : > { %v1400_v50 = vsel %vm1399_vm2, %v1270_v43, %v1398_v34  ;;  %v1458_v34 = vld [vmem:[%s2581_s5 + $0x30] sm:$0xff] }
 0x1b2   : > { %1476 = vmatpush.msra.mxu1 %v1458_v34  ;;  %v2482_v34 = vld [vmem:[%s327_s28] sm:$0xff] }
 0x1b3   : > { %v755_v13 = vpop.xlane.xlu1 %754  ;;  %v800_v60 = vpop.xlane.xlu2 %799 }
 0x1b4   : > { %v710_v19 = vpop.xlane.xlu0 %709  ;;  %v951_v54 = vmul.f32 0.015625, %v755_v13  ;;  %v966_v61 = vmul.f32 0.015625, %v800_v60 }
 0x1b5   : > { %v936_v44 = vmul.f32 0.015625, %v710_v19  ;;  %v979_v19 = vmul.f32 0.015625, %v2352_v33 }
 0x1b6   : > { %v1327_v38 = vperm.slane %v951_v54, %v2285_v4  ;;  %v1356_v46 = vperm.slane %v966_v61, %v2254_v27  ;;  %v1529_v61 = vld [vmem:[%s2582_s6 + $0x60] sm:$0xff] }
 0x1b7   : > { %v1298_v5 = vperm.slane %v936_v44, %v2312_v35 }
 0x1b8   : > { %v1328_v58 = vsel %vm1168_vm13, %v1327_v38, %v1326_v9 }
 0x1b9   : > { %v1299_v45 = vsel %vm1172_vm14, %v1298_v5, %v1297_v53  ;;  %v1381_v5 = vperm.slane %v979_v19, %v2101_v47  ;;  %v1519_v19 = vld [vmem:[%s2582_s6 + $0x10] sm:$0xff] }
 0x1bb   : > { %v713_v36 = vpop.xlane.xlu1 %712  ;;  %v758_v15 = vpop.xlane.xlu2 %757 }
 0x1bc   : > { %v937_v63 = vmul.f32 0.015625, %v713_v36  ;;  %v845_v48 = vpop.xlane.xlu0 %844  ;;  %v952_v28 = vmul.f32 0.015625, %v758_v15  ;;  %v1383_v36 = vperm.slane %v980_v14, %v2140_v25  ;;  %v1382_v25 = vsel %vm1152_vm9, %v1381_v5, %v2337_v29 }
 0x1bd   : > { %v981_v16 = vmul.f32 0.015625, %v845_v48 }
 0x1be   : > { %v1300_v41 = vperm.slane %v937_v63, %v2343_v30  ;;  %v1329_v57 = vperm.slane %v952_v28, %v2312_v35  ;;  %v1384_v54 = vsel %vm1156_vm10, %v1383_v36, %v1382_v25 }
 0x1bf   : > { %v1385_v17 = vperm.slane %v981_v16, %v2197_v26 }
 0x1c0   : > { %v1301_v37 = vsel %vm1176_vm15, %v1300_v41, %v1299_v45  ;;  %v1330_v0 = vsel %vm1172_vm14, %v1329_v57, %v1328_v58  ;;  %v1454_v57 = vld [vmem:[%s2581_s5 + $0x10] sm:$0xff] }
 0x1c1   : > { %v1402_v56 = vsel %vm1401_vm3, %v1301_v37, %v1400_v50  ;;  %v1354_v50 = vperm.slane %v965_v40, %v2197_v26  ;;  %v1386_v45 = vsel %vm1160_vm11, %v1385_v17, %v1384_v54  ;;  %v1532_v40 = vld [vmem:[%s2582_s6 + $0x78] sm:$0xff]  ;;  %v1531_v58 = vld [vmem:[%s2582_s6 + $0x70] sm:$0xff]  ;;  %v1661_v17 = vld [vmem:[%s2583_s7] ss:$0 sm:$0xff] }
 0x1c2   : > { %1537 = vmatpush.msra.mxu3 %v1532_v40 }
 0x1c3   : > { %v848_v23 = vpop.xlane.xlu1 %847  ;;  %v761_v42 = vpop.xlane.xlu2 %760  ;;  %v1355_v62 = vsel %vm1160_vm11, %v1354_v50, %v1353_v18  ;;  %v1523_v50 = vld [vmem:[%s2582_s6 + $0x30] sm:$0xff] }
 0x1c4   : > { %v953_v3 = vmul.f32 0.015625, %v761_v42  ;;  %v803_v6 = vpop.xlane.xlu0 %802  ;;  %v1357_v2 = vsel %vm1164_vm12, %v1356_v46, %v1355_v62  ;;  %v982_v32 = vmul.f32 0.015625, %v848_v23  ;;  %v1455_v23 = vld [vmem:[%s2581_s5 + $0x18] sm:$0xff]  ;;  %v1452_v42 = vld [vmem:[%s2581_s5] sm:$0xff]  ;;  %1538 = vmatpush.msra.mxu3 %v1531_v58  ;;  %v1522_v46 = vld [vmem:[%s2582_s6 + $0x28] sm:$0xff] }
 0x1c5   : > { %v967_v43 = vmul.f32 0.015625, %v803_v6 }
 0x1c6   : > { %v1331_v59 = vperm.slane %v953_v3, %v2343_v30  ;;  %v1387_v47 = vperm.slane %v982_v32, %v2254_v27  ;;  %v1660_v3 = vld [vmem:[%s2580_s4] ss:$0 sm:$0xff] }
 0x1c7   : > { %v1358_v60 = vperm.slane %v967_v43, %v2285_v4  ;;  %v1526_v43 = vld [vmem:[%s2582_s6 + $0x48] sm:$0xff] }
 0x1c8   : > { %v1332_v52 = vsel %vm1176_vm15, %v1331_v59, %v1330_v0  ;;  %v1388_v28 = vsel %vm1164_vm12, %v1387_v47, %v1386_v45  ;;  %v1530_v59 = vld [vmem:[%s2582_s6 + $0x68] sm:$0xff]  ;;  %v1528_v0 = vld [vmem:[%s2582_s6 + $0x58] sm:$0xff] }
 0x1c9   : > { %v1404_v49 = vsel %vm1403_vm4, %v1332_v52, %v1402_v56  ;;  %v1359_v10 = vsel %vm1168_vm13, %v1358_v60, %v1357_v2  ;;  %1539 = vmatpush.msra.mxu3 %v1530_v59  ;;  %v1527_v52 = vld [vmem:[%s2582_s6 + $0x50] sm:$0xff]  ;;  %v1518_v60 = vld [vmem:[%s2582_s6 + $0x8] sm:$0xff] }
 0x1cb   : > { %v851_v11 = vpop.xlane.xlu1 %850  ;;  %v809_v13 = vpop.xlane.xlu2 %808  ;;  %1540 = vmatpush.msra.mxu3 %v1529_v61 }
 0x1cc   : > { %v806_v31 = vpop.xlane.xlu0 %805  ;;  %v969_v24 = vmul.f32 0.015625, %v809_v13  ;;  %v983_v7 = vmul.f32 0.015625, %v851_v11  ;;  %v1521_v11 = vld [vmem:[%s2582_s6 + $0x20] sm:$0xff]  ;;  %v1520_v13 = vld [vmem:[%s2582_s6 + $0x18] sm:$0xff] }
 0x1cd   : > { %v968_v44 = vmul.f32 0.015625, %v806_v31  ;;  %1541 = vmatpush.msra.mxu3 %v1528_v0  ;;  %v1517_v31 = vld [vmem:[%s2582_s6] sm:$0xff] }
 0x1ce   : > { %v1362_v20 = vperm.slane %v969_v24, %v2343_v30  ;;  %v1389_v51 = vperm.slane %v983_v7, %v2285_v4  ;;  %v986_v4 = vadd.f32 %v2484_v21, %v2482_v34 }
 0x1cf   : > { %v1360_v33 = vperm.slane %v968_v44, %v2312_v35  ;;  %1542 = vmatpush.msra.mxu3 %v1527_v52 }
 0x1d0   : > { %v1390_v29 = vsel %vm1168_vm13, %v1389_v51, %v1388_v28 }
 0x1d1   : > { %v1361_v15 = vsel %vm1172_vm14, %v1360_v33, %v1359_v10  ;;  %1543 = vmatpush.msra.mxu3 %v1526_v43 }
 0x1d2   : > { %v1363_v63 = vsel %vm1176_vm15, %v1362_v20, %v1361_v15 }
 0x1d3   : > { %v857_v48 = vpop.xlane.xlu1 %856  ;;  %v1406_v22 = vsel %vm1405_vm5, %v1363_v63, %v1404_v49  ;;  %1544 = vmatpush.msra.mxu3 %v1525_v12  ;;  %v1524_v49 = vld [vmem:[%s2582_s6 + $0x38] sm:$0xff] }
 0x1d4   : > { %v854_v26 = vpop.xlane.xlu0 %853  ;;  %v985_v53 = vmul.f32 0.015625, %v857_v48 }
 0x1d5   : > { %v984_v41 = vmul.f32 0.015625, %v854_v26  ;;  %1545 = vmatpush.msra.mxu3 %v1524_v49 }
 0x1d6   : > { %v1393_v27 = vperm.slane %v985_v53, %v2343_v30  ;;  %v1456_v30 = vld [vmem:[%s2581_s5 + $0x20] sm:$0xff] }
 0x1d7   : > { %v1391_v1 = vperm.slane %v984_v41, %v2312_v35  ;;  %v1457_v35 = vld [vmem:[%s2581_s5 + $0x28] sm:$0xff]  ;;  %1477 = vmatpush.msra.mxu1 %v1456_v30  ;;  %1546 = vmatpush.msra.mxu3 %v1523_v50 }
 0x1d8   : > { %1497 = vmatpush.msra.mxu2 %v1457_v35 }
 0x1d9   : > { %v1392_v37 = vsel %vm1172_vm14, %v1391_v1, %v1390_v29  ;;  %1478 = vmatpush.msra.mxu1 %v1454_v57  ;;  %1547 = vmatpush.msra.mxu3 %v1522_v46 }
 0x1da   : > { %v1394_v55 = vsel %vm1176_vm15, %v1393_v27, %v1392_v37  ;;  %1498 = vmatpush.msra.mxu2 %v1455_v23 }
 0x1db   : > { %v1408_v56 = vsel %vm1407_vm6, %v1394_v55, %v1406_v22  ;;  %1479 = vmatpush.msra.mxu1 %v1452_v42  ;;  %1548 = vmatpush.msra.mxu3 %v1521_v11 }
 0x1dc   : > { %v1410_v38 = vadd.f32 %v1408_v56, %v986_v4  ;;  %1499 = vmatpush.msra.mxu2 %v1453_v39 }
 0x1dd   : > { %1549 = vmatpush.msra.mxu3 %v1520_v13 }
 0x1de   : > { %1447 = vmatmul.f32.vlgmr.msra.gmra.mxu0 %v1410_v38 }
 0x1df   : > { %1550 = vmatpush.msra.mxu3 %v1519_v19 }
 0x1e1   : > { %1551 = vmatpush.msra.mxu3 %v1518_v60 }
 0x1e3   : > { %1552 = vmatpush.msra.mxu3 %v1517_v31 }
 0x25b   : > { %v1448_v6 = vpop.f32.mrf.mxu0 }
 0x25c   : > { %v1449_v8 = vadd.f32 %v1660_v3, %v1448_v6 }
 0x25e   : > { %v1451_v9 = vmax.f32 %v1449_v8, 0.0 }
 0x260   : > { %1647 = vmatmul.msk.f32.vlgmr.msra.gmra.mxu1 %vm1460_vm7, %v1451_v9  ;;  %1648 = vmatmul.msk.f32.vlgmr.msra.gmra.mxu2 %vm1460_vm7, %v1451_v9 }
 0x2dd   : > { %v1481_v24 = vpop.f32.mrf.mxu1 }
 0x2e3   : > { %v1501_v18 = vpop.f32.mrf.mxu2 }
 0x2e4   : > { %v1504_v14 = vmax.f32 %v1481_v24, %v1501_v18 }
 0x2e6   : > { %v1505_v44 = vsub.f32 %v1481_v24, %v1504_v14  ;;  %v1508_v62 = vsub.f32 %v1501_v18, %v1504_v14 }
 0x2e8   : > { %v1506_v16 = vmul.f32 1.442695, %v1505_v44  ;;  %v1509_v20 = vmul.f32 1.442695, %v1508_v62 }
 0x2ea   : > { %1662 = vpow2.f32 %v1506_v16 }
 0x2eb   : > { %1664 = vpow2.f32 %v1509_v20 }
 0x2f0   : > { %v1663_v2 = vpop.eup %1662 }
 0x2f1   : > { %v1665_v32 = vpop.eup %1664  ;;  %v1513_v5 = vmul.f32 %v1663_v2, %v2482_v34 }
 0x2f2   : > { %v1511_v33 = vadd.f32 %v1665_v32, %v1663_v2  ;;  %v1514_v10 = vmul.f32 %v1665_v32, %v2484_v21 }
 0x2f4   : > { %1666 = vrcp.f32 %v1511_v33  ;;  %v1515_v7 = vadd.f32 %v1514_v10, %v1513_v5 }
 0x2fa   : > { %v1667_v36 = vpop.eup %1666 }
 0x2fb   : > { %v1516_v15 = vmul.f32 %v1667_v36, %v1515_v7 }
 0x2fd   : > { %1553 = vmatmul.f32.vlgmr.msra.gmra.mxu3 %v1516_v15 }
 0x380   : > { %v1554_v63 = vpop.f32.mrf.mxu3 }
 0x381   : > { %v1555_v47 = vadd.f32 %v1661_v17, %v1554_v63 }
 0x383   : > { %1558 = vst.msk [vmem:[%s342_s24] sm:$0xff] %vm1557_vm8, %v1555_v47 }
 0x384 PF: > { %s18_s27 = sadd.s32 1, %s1674_s27  }
 0x385   : > { %p15_p5 = scmp.ge.s32.totalorder %s18_s27, 4  }
 0x387   :  { %17 = sbr.rel (!%p15_p5) target bundleno = 1 (0x1), region = 88 }

</bundles_post_ra>
